<compile_context>
chip_gen: v7x
topology: tpu7x:2x2x1
jax: 0.10.0
libtpu: 0.0.40
codegen_flags: <defaults>
</compile_context>

<pallas_src>
import functools
import math

import jax
import jax.numpy as jnp
from jax import lax
from jax.experimental import pallas as pl
from jax.experimental.pallas import tpu as pltpu  # noqa: F401  (TPU backend)

# ----------------------------- model dims -----------------------------------
B, S = 2, 8          # batch, sequence
H = 32               # hidden
HEADS = 2
DH = H // HEADS      # per-head dim
FF = 64              # feed-forward inner dim
VOCAB = 64
LAYERS = 2
POS_MAX = 64
LN_EPS = 1e-6
N = B * S
ATTN_SCALE = 1.0 / math.sqrt(DH)


# ----------------------------- fused kernel ----------------------------------
def _layernorm(x, g, b):
    mu = jnp.mean(x, axis=-1, keepdims=True)
    var = jnp.mean((x - mu) * (x - mu), axis=-1, keepdims=True)
    return (x - mu) * lax.rsqrt(var + LN_EPS) * g + b


def _fused_forward_kernel(
    src_ref, seg_col_ref, seg_row_ref, tgt_ref,
    word_emb_ref, pos_emb_ref, seg_emb_ref, emb_ln_g_ref, emb_ln_b_ref,
    wqkv_ref, bqkv_ref, wo_ref, bo_ref, ln1_g_ref, ln1_b_ref,
    w1_ref, b1_ref, w2_ref, b2_ref, ln2_g_ref, ln2_b_ref,
    mlm_w1_ref, mlm_b1_ref, mlm_ln_g_ref, mlm_ln_b_ref, mlm_b2_ref,
    out_ref,
):
    f32 = jnp.float32

    # ---- embedding: word (one-hot matmul) + position + segment, then LN ----
    src = src_ref[...]                                           # [N, 1] int32
    vocab_iota = lax.broadcasted_iota(jnp.int32, (N, VOCAB), 1)  # [N, VOCAB]
    src_onehot = (vocab_iota == src).astype(f32)
    word_emb = word_emb_ref[...]                                 # [VOCAB, H]
    we = jnp.dot(src_onehot, word_emb, preferred_element_type=f32)   # [N, H]

    pos = pos_emb_ref[0:S, :]                                    # [S, H]
    pe = jnp.concatenate([pos] * B, axis=0)                      # [N, H]

    seg_col = seg_col_ref[...]                                   # [N, 1] int32
    seg_emb = seg_emb_ref[...]                                   # [3, H]
    se = jnp.where(seg_col == 0, seg_emb[0:1, :],
                   jnp.where(seg_col == 1, seg_emb[1:2, :], seg_emb[2:3, :]))

    hidden = _layernorm(we + pe + se, emb_ln_g_ref[...], emb_ln_b_ref[...])

    # additive key mask from seg (padding = seg==0), built in-kernel
    seg_row = seg_row_ref[...]                                   # [B, S] int32
    madd = jnp.where(seg_row > 0, 0.0, -10000.0).astype(f32)     # [B, S]

    # ---- encoder: post-norm transformer layers (fully unrolled) ----
    for layer in range(LAYERS):
        qkv = jnp.dot(hidden, wqkv_ref[layer],
                      preferred_element_type=f32) + bqkv_ref[layer]    # [N, 3H]
        q = qkv[:, 0:H]
        k = qkv[:, H:2 * H]
        v = qkv[:, 2 * H:3 * H]
        wo = wo_ref[layer]                                       # [H, H]
        bo = bo_ref[layer]                                       # [1, H]

        attn_rows = []
        for b in range(B):
            mrow = madd[b:b + 1, :]                              # [1, S]
            acc = None
            for h in range(HEADS):
                qs = q[b * S:(b + 1) * S, h * DH:(h + 1) * DH]   # [S, DH]
                ks = k[b * S:(b + 1) * S, h * DH:(h + 1) * DH]
                vs = v[b * S:(b + 1) * S, h * DH:(h + 1) * DH]
                s = lax.dot_general(qs, ks, (((1,), (1,)), ((), ())),
                                    preferred_element_type=f32) * ATTN_SCALE + mrow
                s = s - jnp.max(s, axis=-1, keepdims=True)
                p = jnp.exp(s)
                p = p * pl.reciprocal(jnp.sum(p, axis=-1, keepdims=True), approx=True)
                ctx = jnp.dot(p, vs, preferred_element_type=f32)            # [S, DH]
                part = jnp.dot(ctx, wo[h * DH:(h + 1) * DH, :],
                               preferred_element_type=f32)                  # [S, H]
                acc = part if acc is None else acc + part
            attn_rows.append(acc + bo)
        attn_out = jnp.concatenate(attn_rows, axis=0)                       # [N, H]

        hidden = _layernorm(attn_out + hidden, ln1_g_ref[layer], ln1_b_ref[layer])

        ff = jnp.dot(hidden, w1_ref[layer], preferred_element_type=f32) + b1_ref[layer]
        ff = jax.nn.gelu(ff, approximate=True)
        ff = jnp.dot(ff, w2_ref[layer], preferred_element_type=f32) + b2_ref[layer]
        hidden = _layernorm(ff + hidden, ln2_g_ref[layer], ln2_b_ref[layer])

    # ---- MLM target head (tied vocab projection via untransposed dot_general) ----
    x = jnp.dot(hidden, mlm_w1_ref[...], preferred_element_type=f32) + mlm_b1_ref[...]
    x = jax.nn.gelu(x, approximate=True)
    x = _layernorm(x, mlm_ln_g_ref[...], mlm_ln_b_ref[...])
    logits = lax.dot_general(x, word_emb, (((1,), (1,)), ((), ())),
                             preferred_element_type=f32) + mlm_b2_ref[...]   # [N, VOCAB]

    # ---- loss / accuracy (one-hot & mask built in-kernel) ----
    tgt = tgt_ref[...]                                           # [N, 1] int32
    onehot = (vocab_iota == tgt).astype(f32)                     # [N, VOCAB]
    msk = (tgt > 0).astype(f32)                                  # [N, 1]

    mx = jnp.max(logits, axis=-1, keepdims=True)
    e = jnp.exp(logits - mx)
    lse = jnp.log(jnp.sum(e, axis=-1, keepdims=True)) + mx
    logp = logits - lse
    tok_loss = -jnp.sum(logp * onehot, axis=-1, keepdims=True)   # [N, 1]

    denom = jnp.sum(msk, keepdims=True) + 1e-6                   # [1, 1]
    loss = jnp.sum(tok_loss * msk, keepdims=True) / denom        # [1, 1]

    # argmax with first-index tie-break (matches torch.argmax semantics)
    pred = jnp.min(jnp.where(logits >= mx, vocab_iota, VOCAB), axis=-1, keepdims=True)
    correct = jnp.sum((pred == tgt).astype(f32) * msk, keepdims=True)        # [1, 1]

    # pack the three scalars into one lane-dense (1,128) output tile
    lane = lax.broadcasted_iota(jnp.int32, (1, 128), 1)
    out_ref[...] = (jnp.where(lane == 0, loss, 0.0)
                    + jnp.where(lane == 1, correct, 0.0)
                    + jnp.where(lane == 2, denom, 0.0))


# ----------------------------- parameters ------------------------------------
def init_params(key):
    def nrm(k, shape, scale=0.02):
        return scale * jax.random.normal(k, shape, dtype=jnp.float32)

    keys = jax.random.split(key, 8 + LAYERS)
    p = {
        "word_emb": nrm(keys[0], (VOCAB, H)),
        "pos_emb": nrm(keys[1], (POS_MAX, H)),
        "seg_emb": nrm(keys[2], (3, H)),
        "emb_ln_g": jnp.ones((1, H), jnp.float32),
        "emb_ln_b": jnp.zeros((1, H), jnp.float32),
        "mlm_w1": nrm(keys[3], (H, H)),
        "mlm_b1": jnp.zeros((1, H), jnp.float32),
        "mlm_ln_g": jnp.ones((1, H), jnp.float32),
        "mlm_ln_b": jnp.zeros((1, H), jnp.float32),
        "mlm_b2": jnp.zeros((1, VOCAB), jnp.float32),
    }

    wqkv, wo, w1, w2 = [], [], [], []
    for l in range(LAYERS):
        lk = jax.random.split(keys[8 + l], 6)
        wqkv.append(jnp.concatenate(
            [nrm(lk[0], (H, H)), nrm(lk[1], (H, H)), nrm(lk[2], (H, H))], axis=1))
        wo.append(nrm(lk[3], (H, H)))
        w1.append(nrm(lk[4], (H, FF)))
        w2.append(nrm(lk[5], (FF, H)))

    # Stacked per-layer weights (fused once at init, outside jit).
    p["wqkv"] = jnp.stack(wqkv)                                   # [L, H, 3H]
    p["bqkv"] = jnp.zeros((LAYERS, 1, 3 * H), jnp.float32)
    p["wo"] = jnp.stack(wo)                                       # [L, H, H]
    p["bo"] = jnp.zeros((LAYERS, 1, H), jnp.float32)
    p["ln1_g"] = jnp.ones((LAYERS, 1, H), jnp.float32)
    p["ln1_b"] = jnp.zeros((LAYERS, 1, H), jnp.float32)
    p["w1"] = jnp.stack(w1)                                       # [L, H, FF]
    p["b1"] = jnp.zeros((LAYERS, 1, FF), jnp.float32)
    p["w2"] = jnp.stack(w2)                                       # [L, FF, H]
    p["b2"] = jnp.zeros((LAYERS, 1, H), jnp.float32)
    p["ln2_g"] = jnp.ones((LAYERS, 1, H), jnp.float32)
    p["ln2_b"] = jnp.zeros((LAYERS, 1, H), jnp.float32)
    return p


# ----------------------------- forward ----------------------------------------
def model_forward(params, src, tgt, seg):
    src_col = src.reshape(N, 1).astype(jnp.int32)
    seg_col = seg.reshape(N, 1).astype(jnp.int32)
    tgt_col = tgt.reshape(N, 1).astype(jnp.int32)
    seg_row = seg.astype(jnp.int32)

    out = pl.pallas_call(
        _fused_forward_kernel,
        out_shape=jax.ShapeDtypeStruct((1, 128), jnp.float32),
    )(
        src_col, seg_col, seg_row, tgt_col,
        params["word_emb"], params["pos_emb"], params["seg_emb"],
        params["emb_ln_g"], params["emb_ln_b"],
        params["wqkv"], params["bqkv"], params["wo"], params["bo"],
        params["ln1_g"], params["ln1_b"],
        params["w1"], params["b1"], params["w2"], params["b2"],
        params["ln2_g"], params["ln2_b"],
        params["mlm_w1"], params["mlm_b1"], params["mlm_ln_g"], params["mlm_ln_b"],
        params["mlm_b2"],
    )
    return out[0, 0], out[0, 1], out[0, 2]


# ----------------------------- main --------------------------------------------
if __name__ == "__main__":
    key = jax.random.PRNGKey(0)
    kp, ks, kt = jax.random.split(key, 3)
    params = init_params(kp)

    src = jax.random.randint(ks, (B, S), 1, VOCAB, dtype=jnp.int32)
    # seg: segment ids (1) with trailing padding (0) in the first example
    seg = jnp.array([[1, 1, 1, 1, 1, 1, 0, 0],
                     [1, 1, 1, 1, 1, 1, 1, 1]], dtype=jnp.int32)
    # tgt (MLM labels): nonzero only at "masked" positions
    tgt = jnp.zeros((B, S), dtype=jnp.int32)
    tgt = tgt.at[0, 2].set(int(jax.random.randint(kt, (), 1, VOCAB)))
    tgt = tgt.at[1, 5].set(7)
    tgt = tgt.at[1, 1].set(13)

    loss, correct, denom = jax.jit(functools.partial(model_forward, params))(src, tgt, seg)
    jax.block_until_ready((loss, correct, denom))
    assert jnp.isfinite(loss), "loss is not finite"
    print("KERNEL_OK")
</pallas_src>

<mosaic_0001>
module attributes {stable_mosaic.version = 11 : i64} {
  func.func @_fused_forward_kernel(%arg0: memref<16x1xi32, #tpu.memory_space<vmem>>, %arg1: memref<16x1xi32, #tpu.memory_space<vmem>>, %arg2: memref<2x8xi32, #tpu.memory_space<vmem>>, %arg3: memref<16x1xi32, #tpu.memory_space<vmem>>, %arg4: memref<64x32xf32, #tpu.memory_space<vmem>>, %arg5: memref<64x32xf32, #tpu.memory_space<vmem>>, %arg6: memref<3x32xf32, #tpu.memory_space<vmem>>, %arg7: memref<1x32xf32, #tpu.memory_space<vmem>>, %arg8: memref<1x32xf32, #tpu.memory_space<vmem>>, %arg9: memref<2x32x96xf32, #tpu.memory_space<vmem>>, %arg10: memref<2x1x96xf32, #tpu.memory_space<vmem>>, %arg11: memref<2x32x32xf32, #tpu.memory_space<vmem>>, %arg12: memref<2x1x32xf32, #tpu.memory_space<vmem>>, %arg13: memref<2x1x32xf32, #tpu.memory_space<vmem>>, %arg14: memref<2x1x32xf32, #tpu.memory_space<vmem>>, %arg15: memref<2x32x64xf32, #tpu.memory_space<vmem>>, %arg16: memref<2x1x64xf32, #tpu.memory_space<vmem>>, %arg17: memref<2x64x32xf32, #tpu.memory_space<vmem>>, %arg18: memref<2x1x32xf32, #tpu.memory_space<vmem>>, %arg19: memref<2x1x32xf32, #tpu.memory_space<vmem>>, %arg20: memref<2x1x32xf32, #tpu.memory_space<vmem>>, %arg21: memref<32x32xf32, #tpu.memory_space<vmem>>, %arg22: memref<1x32xf32, #tpu.memory_space<vmem>>, %arg23: memref<1x32xf32, #tpu.memory_space<vmem>>, %arg24: memref<1x32xf32, #tpu.memory_space<vmem>>, %arg25: memref<1x64xf32, #tpu.memory_space<vmem>>, %arg26: memref<1x128xf32, #tpu.memory_space<vmem>>) attributes {dimension_semantics = [], scalar_prefetch = 0 : i64, scratch_operands = 0 : i64, tpu.core_type = #tpu.core_type<tc>} {
    %c0 = arith.constant 0 : index
    %c0_0 = arith.constant 0 : index
    %0 = vector.load %arg0[%c0, %c0_0] : memref<16x1xi32, #tpu.memory_space<vmem>>, vector<16x1xi32>
    %1 = tpu.iota {dimensions = array<i32: 1>} : vector<16x64xi32>
    %2 = vector.broadcast %0 : vector<16x1xi32> to vector<16x64xi32>
    %3 = arith.cmpi eq, %1, %2 : vector<16x64xi32>
    %4 = arith.extui %3 : vector<16x64xi1> to vector<16x64xi32>
    %5 = arith.sitofp %4 : vector<16x64xi32> to vector<16x64xf32>
    %c0_1 = arith.constant 0 : index
    %c0_2 = arith.constant 0 : index
    %6 = vector.load %arg4[%c0_1, %c0_2] : memref<64x32xf32, #tpu.memory_space<vmem>>, vector<64x32xf32>
    %cst = arith.constant dense<0.000000e+00> : vector<16x32xf32>
    %7 = tpu.matmul %5, %6, %cst {dimension_numbers = #tpu.dot_dimension_numbers<[1], [0], [0], [1], [0, 0, 1, 1], [], []>} : vector<16x64xf32>, vector<64x32xf32>, vector<16x32xf32> -> vector<16x32xf32>
    %c0_3 = arith.constant 0 : index
    %c0_4 = arith.constant 0 : index
    %8 = vector.load %arg5[%c0_3, %c0_4] : memref<64x32xf32, #tpu.memory_space<vmem>>, vector<8x32xf32>
    %9 = tpu.concatenate %8, %8 in 0 : vector<8x32xf32>, vector<8x32xf32> -> vector<16x32xf32>
    %c0_5 = arith.constant 0 : index
    %c0_6 = arith.constant 0 : index
    %10 = vector.load %arg1[%c0_5, %c0_6] : memref<16x1xi32, #tpu.memory_space<vmem>>, vector<16x1xi32>
    %c0_7 = arith.constant 0 : index
    %c0_8 = arith.constant 0 : index
    %11 = vector.load %arg6[%c0_7, %c0_8] : memref<3x32xf32, #tpu.memory_space<vmem>>, vector<3x32xf32>
    %c0_i32 = arith.constant 0 : i32
    %12 = vector.broadcast %c0_i32 : i32 to vector<16x1xi32>
    %13 = arith.cmpi eq, %10, %12 : vector<16x1xi32>
    %14 = vector.extract_strided_slice %11 {offsets = [0, 0], sizes = [1, 32], strides = [1, 1]} : vector<3x32xf32> to vector<1x32xf32>
    %c1_i32 = arith.constant 1 : i32
    %15 = vector.broadcast %c1_i32 : i32 to vector<16x1xi32>
    %16 = arith.cmpi eq, %10, %15 : vector<16x1xi32>
    %17 = vector.extract_strided_slice %11 {offsets = [1, 0], sizes = [1, 32], strides = [1, 1]} : vector<3x32xf32> to vector<1x32xf32>
    %18 = vector.extract_strided_slice %11 {offsets = [2, 0], sizes = [1, 32], strides = [1, 1]} : vector<3x32xf32> to vector<1x32xf32>
    %19 = vector.shape_cast %16 : vector<16x1xi1> to vector<16x1xi1>
    %20 = vector.broadcast %19 : vector<16x1xi1> to vector<16x32xi1>
    %21 = vector.shape_cast %17 : vector<1x32xf32> to vector<1x32xf32>
    %22 = vector.broadcast %21 : vector<1x32xf32> to vector<16x32xf32>
    %23 = vector.shape_cast %18 : vector<1x32xf32> to vector<1x32xf32>
    %24 = vector.broadcast %23 : vector<1x32xf32> to vector<16x32xf32>
    %25 = arith.select %20, %22, %24 : vector<16x32xi1>, vector<16x32xf32>
    %26 = vector.shape_cast %13 : vector<16x1xi1> to vector<16x1xi1>
    %27 = vector.broadcast %26 : vector<16x1xi1> to vector<16x32xi1>
    %28 = vector.shape_cast %14 : vector<1x32xf32> to vector<1x32xf32>
    %29 = vector.broadcast %28 : vector<1x32xf32> to vector<16x32xf32>
    %30 = arith.select %27, %29, %25 : vector<16x32xi1>, vector<16x32xf32>
    %31 = arith.addf %7, %9 : vector<16x32xf32>
    %32 = arith.addf %31, %30 : vector<16x32xf32>
    %c0_9 = arith.constant 0 : index
    %c0_10 = arith.constant 0 : index
    %33 = vector.load %arg7[%c0_9, %c0_10] : memref<1x32xf32, #tpu.memory_space<vmem>>, vector<1x32xf32>
    %c0_11 = arith.constant 0 : index
    %c0_12 = arith.constant 0 : index
    %34 = vector.load %arg8[%c0_11, %c0_12] : memref<1x32xf32, #tpu.memory_space<vmem>>, vector<1x32xf32>
    %cst_13 = arith.constant dense<0.000000e+00> : vector<16xf32>
    %35 = vector.multi_reduction <add>, %32, %cst_13 [1] : vector<16x32xf32> to vector<16xf32>
    %36 = vector.shape_cast %35 : vector<16xf32> to vector<16x1xf32>
    %cst_14 = arith.constant 3.200000e+01 : f32
    %37 = vector.broadcast %cst_14 : f32 to vector<16x1xf32>
    %38 = arith.divf %36, %37 : vector<16x1xf32>
    %39 = vector.broadcast %38 : vector<16x1xf32> to vector<16x32xf32>
    %40 = arith.subf %32, %39 : vector<16x32xf32>
    %41 = vector.broadcast %38 : vector<16x1xf32> to vector<16x32xf32>
    %42 = arith.subf %32, %41 : vector<16x32xf32>
    %43 = arith.mulf %40, %42 : vector<16x32xf32>
    %cst_15 = arith.constant dense<0.000000e+00> : vector<16xf32>
    %44 = vector.multi_reduction <add>, %43, %cst_15 [1] : vector<16x32xf32> to vector<16xf32>
    %45 = vector.shape_cast %44 : vector<16xf32> to vector<16x1xf32>
    %cst_16 = arith.constant 3.200000e+01 : f32
    %46 = vector.broadcast %cst_16 : f32 to vector<16x1xf32>
    %47 = arith.divf %45, %46 : vector<16x1xf32>
    %48 = vector.broadcast %38 : vector<16x1xf32> to vector<16x32xf32>
    %49 = arith.subf %32, %48 : vector<16x32xf32>
    %cst_17 = arith.constant 9.99999997E-7 : f32
    %50 = vector.broadcast %cst_17 : f32 to vector<16x1xf32>
    %51 = arith.addf %47, %50 : vector<16x1xf32>
    %52 = math.rsqrt %51 : vector<16x1xf32>
    %53 = vector.broadcast %52 : vector<16x1xf32> to vector<16x32xf32>
    %54 = arith.mulf %49, %53 : vector<16x32xf32>
    %55 = vector.broadcast %33 : vector<1x32xf32> to vector<16x32xf32>
    %56 = arith.mulf %54, %55 : vector<16x32xf32>
    %57 = vector.broadcast %34 : vector<1x32xf32> to vector<16x32xf32>
    %58 = arith.addf %56, %57 : vector<16x32xf32>
    %c0_18 = arith.constant 0 : index
    %c0_19 = arith.constant 0 : index
    %59 = vector.load %arg2[%c0_18, %c0_19] : memref<2x8xi32, #tpu.memory_space<vmem>>, vector<2x8xi32>
    %c0_i32_20 = arith.constant 0 : i32
    %60 = vector.broadcast %c0_i32_20 : i32 to vector<2x8xi32>
    %61 = arith.cmpi sgt, %59, %60 : vector<2x8xi32>
    %cst_21 = arith.constant 0.000000e+00 : f32
    %cst_22 = arith.constant -1.000000e+04 : f32
    %62 = vector.broadcast %cst_21 : f32 to vector<2x8xf32>
    %63 = vector.broadcast %cst_22 : f32 to vector<2x8xf32>
    %64 = arith.select %61, %62, %63 : vector<2x8xi1>, vector<2x8xf32>
    %c0_23 = arith.constant 0 : index
    %c0_24 = arith.constant 0 : index
    %c0_25 = arith.constant 0 : index
    %65 = vector.load %arg9[%c0_23, %c0_24, %c0_25] : memref<2x32x96xf32, #tpu.memory_space<vmem>>, vector<1x32x96xf32>
    %66 = vector.shape_cast %65 : vector<1x32x96xf32> to vector<32x96xf32>
    %cst_26 = arith.constant dense<0.000000e+00> : vector<16x96xf32>
    %67 = tpu.matmul %58, %66, %cst_26 {dimension_numbers = #tpu.dot_dimension_numbers<[1], [0], [0], [1], [0, 0, 1, 1], [], []>} : vector<16x32xf32>, vector<32x96xf32>, vector<16x96xf32> -> vector<16x96xf32>
    %c0_27 = arith.constant 0 : index
    %c0_28 = arith.constant 0 : index
    %c0_29 = arith.constant 0 : index
    %68 = vector.load %arg10[%c0_27, %c0_28, %c0_29] : memref<2x1x96xf32, #tpu.memory_space<vmem>>, vector<1x1x96xf32>
    %69 = vector.shape_cast %68 : vector<1x1x96xf32> to vector<1x96xf32>
    %70 = vector.broadcast %69 : vector<1x96xf32> to vector<16x96xf32>
    %71 = arith.addf %67, %70 : vector<16x96xf32>
    %72 = vector.extract_strided_slice %71 {offsets = [0, 0], sizes = [16, 32], strides = [1, 1]} : vector<16x96xf32> to vector<16x32xf32>
    %73 = vector.extract_strided_slice %71 {offsets = [0, 32], sizes = [16, 32], strides = [1, 1]} : vector<16x96xf32> to vector<16x32xf32>
    %74 = vector.extract_strided_slice %71 {offsets = [0, 64], sizes = [16, 32], strides = [1, 1]} : vector<16x96xf32> to vector<16x32xf32>
    %c0_30 = arith.constant 0 : index
    %c0_31 = arith.constant 0 : index
    %c0_32 = arith.constant 0 : index
    %75 = vector.load %arg11[%c0_30, %c0_31, %c0_32] : memref<2x32x32xf32, #tpu.memory_space<vmem>>, vector<1x32x32xf32>
    %76 = vector.shape_cast %75 : vector<1x32x32xf32> to vector<32x32xf32>
    %c0_33 = arith.constant 0 : index
    %c0_34 = arith.constant 0 : index
    %c0_35 = arith.constant 0 : index
    %77 = vector.load %arg12[%c0_33, %c0_34, %c0_35] : memref<2x1x32xf32, #tpu.memory_space<vmem>>, vector<1x1x32xf32>
    %78 = vector.shape_cast %77 : vector<1x1x32xf32> to vector<1x32xf32>
    %79 = vector.extract_strided_slice %64 {offsets = [0, 0], sizes = [1, 8], strides = [1, 1]} : vector<2x8xf32> to vector<1x8xf32>
    %80 = vector.extract_strided_slice %72 {offsets = [0, 0], sizes = [8, 16], strides = [1, 1]} : vector<16x32xf32> to vector<8x16xf32>
    %81 = vector.extract_strided_slice %73 {offsets = [0, 0], sizes = [8, 16], strides = [1, 1]} : vector<16x32xf32> to vector<8x16xf32>
    %82 = vector.extract_strided_slice %74 {offsets = [0, 0], sizes = [8, 16], strides = [1, 1]} : vector<16x32xf32> to vector<8x16xf32>
    %cst_36 = arith.constant dense<0.000000e+00> : vector<8x8xf32>
    %83 = tpu.matmul %80, %81, %cst_36 {dimension_numbers = #tpu.dot_dimension_numbers<[1], [1], [0], [0], [0, 0, 1, 0], [], []>} : vector<8x16xf32>, vector<8x16xf32>, vector<8x8xf32> -> vector<8x8xf32>
    %cst_37 = arith.constant 2.500000e-01 : f32
    %84 = vector.broadcast %cst_37 : f32 to vector<8x8xf32>
    %85 = arith.mulf %83, %84 : vector<8x8xf32>
    %86 = vector.broadcast %79 : vector<1x8xf32> to vector<8x8xf32>
    %87 = arith.addf %85, %86 : vector<8x8xf32>
    %cst_38 = arith.constant dense<0xFF800000> : vector<8xf32>
    %88 = vector.multi_reduction <maximumf>, %87, %cst_38 [1] : vector<8x8xf32> to vector<8xf32>
    %89 = vector.shape_cast %88 : vector<8xf32> to vector<8x1xf32>
    %90 = vector.broadcast %89 : vector<8x1xf32> to vector<8x8xf32>
    %91 = arith.subf %87, %90 : vector<8x8xf32>
    %92 = math.exp %91 : vector<8x8xf32>
    %cst_39 = arith.constant dense<0.000000e+00> : vector<8xf32>
    %93 = vector.multi_reduction <add>, %92, %cst_39 [1] : vector<8x8xf32> to vector<8xf32>
    %94 = vector.shape_cast %93 : vector<8xf32> to vector<8x1xf32>
    %95 = tpu.reciprocal %94 {approx = true} : vector<8x1xf32> -> vector<8x1xf32>
    %96 = vector.broadcast %95 : vector<8x1xf32> to vector<8x8xf32>
    %97 = arith.mulf %92, %96 : vector<8x8xf32>
    %cst_40 = arith.constant dense<0.000000e+00> : vector<8x16xf32>
    %98 = tpu.matmul %97, %82, %cst_40 {dimension_numbers = #tpu.dot_dimension_numbers<[1], [0], [0], [1], [0, 0, 1, 1], [], []>} : vector<8x8xf32>, vector<8x16xf32>, vector<8x16xf32> -> vector<8x16xf32>
    %99 = vector.extract_strided_slice %76 {offsets = [0, 0], sizes = [16, 32], strides = [1, 1]} : vector<32x32xf32> to vector<16x32xf32>
    %cst_41 = arith.constant dense<0.000000e+00> : vector<8x32xf32>
    %100 = tpu.matmul %98, %99, %cst_41 {dimension_numbers = #tpu.dot_dimension_numbers<[1], [0], [0], [1], [0, 0, 1, 1], [], []>} : vector<8x16xf32>, vector<16x32xf32>, vector<8x32xf32> -> vector<8x32xf32>
    %101 = vector.extract_strided_slice %72 {offsets = [0, 16], sizes = [8, 16], strides = [1, 1]} : vector<16x32xf32> to vector<8x16xf32>
    %102 = vector.extract_strided_slice %73 {offsets = [0, 16], sizes = [8, 16], strides = [1, 1]} : vector<16x32xf32> to vector<8x16xf32>
    %103 = vector.extract_strided_slice %74 {offsets = [0, 16], sizes = [8, 16], strides = [1, 1]} : vector<16x32xf32> to vector<8x16xf32>
    %cst_42 = arith.constant dense<0.000000e+00> : vector<8x8xf32>
    %104 = tpu.matmul %101, %102, %cst_42 {dimension_numbers = #tpu.dot_dimension_numbers<[1], [1], [0], [0], [0, 0, 1, 0], [], []>} : vector<8x16xf32>, vector<8x16xf32>, vector<8x8xf32> -> vector<8x8xf32>
    %cst_43 = arith.constant 2.500000e-01 : f32
    %105 = vector.broadcast %cst_43 : f32 to vector<8x8xf32>
    %106 = arith.mulf %104, %105 : vector<8x8xf32>
    %107 = vector.broadcast %79 : vector<1x8xf32> to vector<8x8xf32>
    %108 = arith.addf %106, %107 : vector<8x8xf32>
    %cst_44 = arith.constant dense<0xFF800000> : vector<8xf32>
    %109 = vector.multi_reduction <maximumf>, %108, %cst_44 [1] : vector<8x8xf32> to vector<8xf32>
    %110 = vector.shape_cast %109 : vector<8xf32> to vector<8x1xf32>
    %111 = vector.broadcast %110 : vector<8x1xf32> to vector<8x8xf32>
    %112 = arith.subf %108, %111 : vector<8x8xf32>
    %113 = math.exp %112 : vector<8x8xf32>
    %cst_45 = arith.constant dense<0.000000e+00> : vector<8xf32>
    %114 = vector.multi_reduction <add>, %113, %cst_45 [1] : vector<8x8xf32> to vector<8xf32>
    %115 = vector.shape_cast %114 : vector<8xf32> to vector<8x1xf32>
    %116 = tpu.reciprocal %115 {approx = true} : vector<8x1xf32> -> vector<8x1xf32>
    %117 = vector.broadcast %116 : vector<8x1xf32> to vector<8x8xf32>
    %118 = arith.mulf %113, %117 : vector<8x8xf32>
    %cst_46 = arith.constant dense<0.000000e+00> : vector<8x16xf32>
    %119 = tpu.matmul %118, %103, %cst_46 {dimension_numbers = #tpu.dot_dimension_numbers<[1], [0], [0], [1], [0, 0, 1, 1], [], []>} : vector<8x8xf32>, vector<8x16xf32>, vector<8x16xf32> -> vector<8x16xf32>
    %120 = vector.extract_strided_slice %76 {offsets = [16, 0], sizes = [16, 32], strides = [1, 1]} : vector<32x32xf32> to vector<16x32xf32>
    %cst_47 = arith.constant dense<0.000000e+00> : vector<8x32xf32>
    %121 = tpu.matmul %119, %120, %cst_47 {dimension_numbers = #tpu.dot_dimension_numbers<[1], [0], [0], [1], [0, 0, 1, 1], [], []>} : vector<8x16xf32>, vector<16x32xf32>, vector<8x32xf32> -> vector<8x32xf32>
    %122 = arith.addf %100, %121 : vector<8x32xf32>
    %123 = vector.broadcast %78 : vector<1x32xf32> to vector<8x32xf32>
    %124 = arith.addf %122, %123 : vector<8x32xf32>
    %125 = vector.extract_strided_slice %64 {offsets = [1, 0], sizes = [1, 8], strides = [1, 1]} : vector<2x8xf32> to vector<1x8xf32>
    %126 = vector.extract_strided_slice %72 {offsets = [8, 0], sizes = [8, 16], strides = [1, 1]} : vector<16x32xf32> to vector<8x16xf32>
    %127 = vector.extract_strided_slice %73 {offsets = [8, 0], sizes = [8, 16], strides = [1, 1]} : vector<16x32xf32> to vector<8x16xf32>
    %128 = vector.extract_strided_slice %74 {offsets = [8, 0], sizes = [8, 16], strides = [1, 1]} : vector<16x32xf32> to vector<8x16xf32>
    %cst_48 = arith.constant dense<0.000000e+00> : vector<8x8xf32>
    %129 = tpu.matmul %126, %127, %cst_48 {dimension_numbers = #tpu.dot_dimension_numbers<[1], [1], [0], [0], [0, 0, 1, 0], [], []>} : vector<8x16xf32>, vector<8x16xf32>, vector<8x8xf32> -> vector<8x8xf32>
    %cst_49 = arith.constant 2.500000e-01 : f32
    %130 = vector.broadcast %cst_49 : f32 to vector<8x8xf32>
    %131 = arith.mulf %129, %130 : vector<8x8xf32>
    %132 = vector.broadcast %125 : vector<1x8xf32> to vector<8x8xf32>
    %133 = arith.addf %131, %132 : vector<8x8xf32>
    %cst_50 = arith.constant dense<0xFF800000> : vector<8xf32>
    %134 = vector.multi_reduction <maximumf>, %133, %cst_50 [1] : vector<8x8xf32> to vector<8xf32>
    %135 = vector.shape_cast %134 : vector<8xf32> to vector<8x1xf32>
    %136 = vector.broadcast %135 : vector<8x1xf32> to vector<8x8xf32>
    %137 = arith.subf %133, %136 : vector<8x8xf32>
    %138 = math.exp %137 : vector<8x8xf32>
    %cst_51 = arith.constant dense<0.000000e+00> : vector<8xf32>
    %139 = vector.multi_reduction <add>, %138, %cst_51 [1] : vector<8x8xf32> to vector<8xf32>
    %140 = vector.shape_cast %139 : vector<8xf32> to vector<8x1xf32>
    %141 = tpu.reciprocal %140 {approx = true} : vector<8x1xf32> -> vector<8x1xf32>
    %142 = vector.broadcast %141 : vector<8x1xf32> to vector<8x8xf32>
    %143 = arith.mulf %138, %142 : vector<8x8xf32>
    %cst_52 = arith.constant dense<0.000000e+00> : vector<8x16xf32>
    %144 = tpu.matmul %143, %128, %cst_52 {dimension_numbers = #tpu.dot_dimension_numbers<[1], [0], [0], [1], [0, 0, 1, 1], [], []>} : vector<8x8xf32>, vector<8x16xf32>, vector<8x16xf32> -> vector<8x16xf32>
    %145 = vector.extract_strided_slice %76 {offsets = [0, 0], sizes = [16, 32], strides = [1, 1]} : vector<32x32xf32> to vector<16x32xf32>
    %cst_53 = arith.constant dense<0.000000e+00> : vector<8x32xf32>
    %146 = tpu.matmul %144, %145, %cst_53 {dimension_numbers = #tpu.dot_dimension_numbers<[1], [0], [0], [1], [0, 0, 1, 1], [], []>} : vector<8x16xf32>, vector<16x32xf32>, vector<8x32xf32> -> vector<8x32xf32>
    %147 = vector.extract_strided_slice %72 {offsets = [8, 16], sizes = [8, 16], strides = [1, 1]} : vector<16x32xf32> to vector<8x16xf32>
    %148 = vector.extract_strided_slice %73 {offsets = [8, 16], sizes = [8, 16], strides = [1, 1]} : vector<16x32xf32> to vector<8x16xf32>
    %149 = vector.extract_strided_slice %74 {offsets = [8, 16], sizes = [8, 16], strides = [1, 1]} : vector<16x32xf32> to vector<8x16xf32>
    %cst_54 = arith.constant dense<0.000000e+00> : vector<8x8xf32>
    %150 = tpu.matmul %147, %148, %cst_54 {dimension_numbers = #tpu.dot_dimension_numbers<[1], [1], [0], [0], [0, 0, 1, 0], [], []>} : vector<8x16xf32>, vector<8x16xf32>, vector<8x8xf32> -> vector<8x8xf32>
    %cst_55 = arith.constant 2.500000e-01 : f32
    %151 = vector.broadcast %cst_55 : f32 to vector<8x8xf32>
    %152 = arith.mulf %150, %151 : vector<8x8xf32>
    %153 = vector.broadcast %125 : vector<1x8xf32> to vector<8x8xf32>
    %154 = arith.addf %152, %153 : vector<8x8xf32>
    %cst_56 = arith.constant dense<0xFF800000> : vector<8xf32>
    %155 = vector.multi_reduction <maximumf>, %154, %cst_56 [1] : vector<8x8xf32> to vector<8xf32>
    %156 = vector.shape_cast %155 : vector<8xf32> to vector<8x1xf32>
    %157 = vector.broadcast %156 : vector<8x1xf32> to vector<8x8xf32>
    %158 = arith.subf %154, %157 : vector<8x8xf32>
    %159 = math.exp %158 : vector<8x8xf32>
    %cst_57 = arith.constant dense<0.000000e+00> : vector<8xf32>
    %160 = vector.multi_reduction <add>, %159, %cst_57 [1] : vector<8x8xf32> to vector<8xf32>
    %161 = vector.shape_cast %160 : vector<8xf32> to vector<8x1xf32>
    %162 = tpu.reciprocal %161 {approx = true} : vector<8x1xf32> -> vector<8x1xf32>
    %163 = vector.broadcast %162 : vector<8x1xf32> to vector<8x8xf32>
    %164 = arith.mulf %159, %163 : vector<8x8xf32>
    %cst_58 = arith.constant dense<0.000000e+00> : vector<8x16xf32>
    %165 = tpu.matmul %164, %149, %cst_58 {dimension_numbers = #tpu.dot_dimension_numbers<[1], [0], [0], [1], [0, 0, 1, 1], [], []>} : vector<8x8xf32>, vector<8x16xf32>, vector<8x16xf32> -> vector<8x16xf32>
    %166 = vector.extract_strided_slice %76 {offsets = [16, 0], sizes = [16, 32], strides = [1, 1]} : vector<32x32xf32> to vector<16x32xf32>
    %cst_59 = arith.constant dense<0.000000e+00> : vector<8x32xf32>
    %167 = tpu.matmul %165, %166, %cst_59 {dimension_numbers = #tpu.dot_dimension_numbers<[1], [0], [0], [1], [0, 0, 1, 1], [], []>} : vector<8x16xf32>, vector<16x32xf32>, vector<8x32xf32> -> vector<8x32xf32>
    %168 = arith.addf %146, %167 : vector<8x32xf32>
    %169 = vector.broadcast %78 : vector<1x32xf32> to vector<8x32xf32>
    %170 = arith.addf %168, %169 : vector<8x32xf32>
    %171 = tpu.concatenate %124, %170 in 0 : vector<8x32xf32>, vector<8x32xf32> -> vector<16x32xf32>
    %172 = arith.addf %171, %58 : vector<16x32xf32>
    %c0_60 = arith.constant 0 : index
    %c0_61 = arith.constant 0 : index
    %c0_62 = arith.constant 0 : index
    %173 = vector.load %arg13[%c0_60, %c0_61, %c0_62] : memref<2x1x32xf32, #tpu.memory_space<vmem>>, vector<1x1x32xf32>
    %174 = vector.shape_cast %173 : vector<1x1x32xf32> to vector<1x32xf32>
    %c0_63 = arith.constant 0 : index
    %c0_64 = arith.constant 0 : index
    %c0_65 = arith.constant 0 : index
    %175 = vector.load %arg14[%c0_63, %c0_64, %c0_65] : memref<2x1x32xf32, #tpu.memory_space<vmem>>, vector<1x1x32xf32>
    %176 = vector.shape_cast %175 : vector<1x1x32xf32> to vector<1x32xf32>
    %cst_66 = arith.constant dense<0.000000e+00> : vector<16xf32>
    %177 = vector.multi_reduction <add>, %172, %cst_66 [1] : vector<16x32xf32> to vector<16xf32>
    %178 = vector.shape_cast %177 : vector<16xf32> to vector<16x1xf32>
    %cst_67 = arith.constant 3.200000e+01 : f32
    %179 = vector.broadcast %cst_67 : f32 to vector<16x1xf32>
    %180 = arith.divf %178, %179 : vector<16x1xf32>
    %181 = vector.broadcast %180 : vector<16x1xf32> to vector<16x32xf32>
    %182 = arith.subf %172, %181 : vector<16x32xf32>
    %183 = vector.broadcast %180 : vector<16x1xf32> to vector<16x32xf32>
    %184 = arith.subf %172, %183 : vector<16x32xf32>
    %185 = arith.mulf %182, %184 : vector<16x32xf32>
    %cst_68 = arith.constant dense<0.000000e+00> : vector<16xf32>
    %186 = vector.multi_reduction <add>, %185, %cst_68 [1] : vector<16x32xf32> to vector<16xf32>
    %187 = vector.shape_cast %186 : vector<16xf32> to vector<16x1xf32>
    %cst_69 = arith.constant 3.200000e+01 : f32
    %188 = vector.broadcast %cst_69 : f32 to vector<16x1xf32>
    %189 = arith.divf %187, %188 : vector<16x1xf32>
    %190 = vector.broadcast %180 : vector<16x1xf32> to vector<16x32xf32>
    %191 = arith.subf %172, %190 : vector<16x32xf32>
    %cst_70 = arith.constant 9.99999997E-7 : f32
    %192 = vector.broadcast %cst_70 : f32 to vector<16x1xf32>
    %193 = arith.addf %189, %192 : vector<16x1xf32>
    %194 = math.rsqrt %193 : vector<16x1xf32>
    %195 = vector.broadcast %194 : vector<16x1xf32> to vector<16x32xf32>
    %196 = arith.mulf %191, %195 : vector<16x32xf32>
    %197 = vector.broadcast %174 : vector<1x32xf32> to vector<16x32xf32>
    %198 = arith.mulf %196, %197 : vector<16x32xf32>
    %199 = vector.broadcast %176 : vector<1x32xf32> to vector<16x32xf32>
    %200 = arith.addf %198, %199 : vector<16x32xf32>
    %c0_71 = arith.constant 0 : index
    %c0_72 = arith.constant 0 : index
    %c0_73 = arith.constant 0 : index
    %201 = vector.load %arg15[%c0_71, %c0_72, %c0_73] : memref<2x32x64xf32, #tpu.memory_space<vmem>>, vector<1x32x64xf32>
    %202 = vector.shape_cast %201 : vector<1x32x64xf32> to vector<32x64xf32>
    %cst_74 = arith.constant dense<0.000000e+00> : vector<16x64xf32>
    %203 = tpu.matmul %200, %202, %cst_74 {dimension_numbers = #tpu.dot_dimension_numbers<[1], [0], [0], [1], [0, 0, 1, 1], [], []>} : vector<16x32xf32>, vector<32x64xf32>, vector<16x64xf32> -> vector<16x64xf32>
    %c0_75 = arith.constant 0 : index
    %c0_76 = arith.constant 0 : index
    %c0_77 = arith.constant 0 : index
    %204 = vector.load %arg16[%c0_75, %c0_76, %c0_77] : memref<2x1x64xf32, #tpu.memory_space<vmem>>, vector<1x1x64xf32>
    %205 = vector.shape_cast %204 : vector<1x1x64xf32> to vector<1x64xf32>
    %206 = vector.broadcast %205 : vector<1x64xf32> to vector<16x64xf32>
    %207 = arith.addf %203, %206 : vector<16x64xf32>
    %208 = arith.mulf %207, %207 : vector<16x64xf32>
    %209 = arith.mulf %207, %208 : vector<16x64xf32>
    %cst_78 = arith.constant 4.471500e-02 : f32
    %210 = vector.broadcast %cst_78 : f32 to vector<16x64xf32>
    %211 = arith.mulf %210, %209 : vector<16x64xf32>
    %212 = arith.addf %207, %211 : vector<16x64xf32>
    %cst_79 = arith.constant 0.797884583 : f32
    %213 = vector.broadcast %cst_79 : f32 to vector<16x64xf32>
    %214 = arith.mulf %213, %212 : vector<16x64xf32>
    %215 = math.tanh %214 : vector<16x64xf32>
    %cst_80 = arith.constant 1.000000e+00 : f32
    %216 = vector.broadcast %cst_80 : f32 to vector<16x64xf32>
    %217 = arith.addf %216, %215 : vector<16x64xf32>
    %cst_81 = arith.constant 5.000000e-01 : f32
    %218 = vector.broadcast %cst_81 : f32 to vector<16x64xf32>
    %219 = arith.mulf %218, %217 : vector<16x64xf32>
    %220 = arith.mulf %207, %219 : vector<16x64xf32>
    %c0_82 = arith.constant 0 : index
    %c0_83 = arith.constant 0 : index
    %c0_84 = arith.constant 0 : index
    %221 = vector.load %arg17[%c0_82, %c0_83, %c0_84] : memref<2x64x32xf32, #tpu.memory_space<vmem>>, vector<1x64x32xf32>
    %222 = vector.shape_cast %221 : vector<1x64x32xf32> to vector<64x32xf32>
    %cst_85 = arith.constant dense<0.000000e+00> : vector<16x32xf32>
    %223 = tpu.matmul %220, %222, %cst_85 {dimension_numbers = #tpu.dot_dimension_numbers<[1], [0], [0], [1], [0, 0, 1, 1], [], []>} : vector<16x64xf32>, vector<64x32xf32>, vector<16x32xf32> -> vector<16x32xf32>
    %c0_86 = arith.constant 0 : index
    %c0_87 = arith.constant 0 : index
    %c0_88 = arith.constant 0 : index
    %224 = vector.load %arg18[%c0_86, %c0_87, %c0_88] : memref<2x1x32xf32, #tpu.memory_space<vmem>>, vector<1x1x32xf32>
    %225 = vector.shape_cast %224 : vector<1x1x32xf32> to vector<1x32xf32>
    %226 = vector.broadcast %225 : vector<1x32xf32> to vector<16x32xf32>
    %227 = arith.addf %223, %226 : vector<16x32xf32>
    %228 = arith.addf %227, %200 : vector<16x32xf32>
    %c0_89 = arith.constant 0 : index
    %c0_90 = arith.constant 0 : index
    %c0_91 = arith.constant 0 : index
    %229 = vector.load %arg19[%c0_89, %c0_90, %c0_91] : memref<2x1x32xf32, #tpu.memory_space<vmem>>, vector<1x1x32xf32>
    %230 = vector.shape_cast %229 : vector<1x1x32xf32> to vector<1x32xf32>
    %c0_92 = arith.constant 0 : index
    %c0_93 = arith.constant 0 : index
    %c0_94 = arith.constant 0 : index
    %231 = vector.load %arg20[%c0_92, %c0_93, %c0_94] : memref<2x1x32xf32, #tpu.memory_space<vmem>>, vector<1x1x32xf32>
    %232 = vector.shape_cast %231 : vector<1x1x32xf32> to vector<1x32xf32>
    %cst_95 = arith.constant dense<0.000000e+00> : vector<16xf32>
    %233 = vector.multi_reduction <add>, %228, %cst_95 [1] : vector<16x32xf32> to vector<16xf32>
    %234 = vector.shape_cast %233 : vector<16xf32> to vector<16x1xf32>
    %cst_96 = arith.constant 3.200000e+01 : f32
    %235 = vector.broadcast %cst_96 : f32 to vector<16x1xf32>
    %236 = arith.divf %234, %235 : vector<16x1xf32>
    %237 = vector.broadcast %236 : vector<16x1xf32> to vector<16x32xf32>
    %238 = arith.subf %228, %237 : vector<16x32xf32>
    %239 = vector.broadcast %236 : vector<16x1xf32> to vector<16x32xf32>
    %240 = arith.subf %228, %239 : vector<16x32xf32>
    %241 = arith.mulf %238, %240 : vector<16x32xf32>
    %cst_97 = arith.constant dense<0.000000e+00> : vector<16xf32>
    %242 = vector.multi_reduction <add>, %241, %cst_97 [1] : vector<16x32xf32> to vector<16xf32>
    %243 = vector.shape_cast %242 : vector<16xf32> to vector<16x1xf32>
    %cst_98 = arith.constant 3.200000e+01 : f32
    %244 = vector.broadcast %cst_98 : f32 to vector<16x1xf32>
    %245 = arith.divf %243, %244 : vector<16x1xf32>
    %246 = vector.broadcast %236 : vector<16x1xf32> to vector<16x32xf32>
    %247 = arith.subf %228, %246 : vector<16x32xf32>
    %cst_99 = arith.constant 9.99999997E-7 : f32
    %248 = vector.broadcast %cst_99 : f32 to vector<16x1xf32>
    %249 = arith.addf %245, %248 : vector<16x1xf32>
    %250 = math.rsqrt %249 : vector<16x1xf32>
    %251 = vector.broadcast %250 : vector<16x1xf32> to vector<16x32xf32>
    %252 = arith.mulf %247, %251 : vector<16x32xf32>
    %253 = vector.broadcast %230 : vector<1x32xf32> to vector<16x32xf32>
    %254 = arith.mulf %252, %253 : vector<16x32xf32>
    %255 = vector.broadcast %232 : vector<1x32xf32> to vector<16x32xf32>
    %256 = arith.addf %254, %255 : vector<16x32xf32>
    %c1 = arith.constant 1 : index
    %c0_100 = arith.constant 0 : index
    %c0_101 = arith.constant 0 : index
    %257 = vector.load %arg9[%c1, %c0_100, %c0_101] : memref<2x32x96xf32, #tpu.memory_space<vmem>>, vector<1x32x96xf32>
    %258 = vector.shape_cast %257 : vector<1x32x96xf32> to vector<32x96xf32>
    %cst_102 = arith.constant dense<0.000000e+00> : vector<16x96xf32>
    %259 = tpu.matmul %256, %258, %cst_102 {dimension_numbers = #tpu.dot_dimension_numbers<[1], [0], [0], [1], [0, 0, 1, 1], [], []>} : vector<16x32xf32>, vector<32x96xf32>, vector<16x96xf32> -> vector<16x96xf32>
    %c1_103 = arith.constant 1 : index
    %c0_104 = arith.constant 0 : index
    %c0_105 = arith.constant 0 : index
    %260 = vector.load %arg10[%c1_103, %c0_104, %c0_105] : memref<2x1x96xf32, #tpu.memory_space<vmem>>, vector<1x1x96xf32>
    %261 = vector.shape_cast %260 : vector<1x1x96xf32> to vector<1x96xf32>
    %262 = vector.broadcast %261 : vector<1x96xf32> to vector<16x96xf32>
    %263 = arith.addf %259, %262 : vector<16x96xf32>
    %264 = vector.extract_strided_slice %263 {offsets = [0, 0], sizes = [16, 32], strides = [1, 1]} : vector<16x96xf32> to vector<16x32xf32>
    %265 = vector.extract_strided_slice %263 {offsets = [0, 32], sizes = [16, 32], strides = [1, 1]} : vector<16x96xf32> to vector<16x32xf32>
    %266 = vector.extract_strided_slice %263 {offsets = [0, 64], sizes = [16, 32], strides = [1, 1]} : vector<16x96xf32> to vector<16x32xf32>
    %c1_106 = arith.constant 1 : index
    %c0_107 = arith.constant 0 : index
    %c0_108 = arith.constant 0 : index
    %267 = vector.load %arg11[%c1_106, %c0_107, %c0_108] : memref<2x32x32xf32, #tpu.memory_space<vmem>>, vector<1x32x32xf32>
    %268 = vector.shape_cast %267 : vector<1x32x32xf32> to vector<32x32xf32>
    %c1_109 = arith.constant 1 : index
    %c0_110 = arith.constant 0 : index
    %c0_111 = arith.constant 0 : index
    %269 = vector.load %arg12[%c1_109, %c0_110, %c0_111] : memref<2x1x32xf32, #tpu.memory_space<vmem>>, vector<1x1x32xf32>
    %270 = vector.shape_cast %269 : vector<1x1x32xf32> to vector<1x32xf32>
    %271 = vector.extract_strided_slice %64 {offsets = [0, 0], sizes = [1, 8], strides = [1, 1]} : vector<2x8xf32> to vector<1x8xf32>
    %272 = vector.extract_strided_slice %264 {offsets = [0, 0], sizes = [8, 16], strides = [1, 1]} : vector<16x32xf32> to vector<8x16xf32>
    %273 = vector.extract_strided_slice %265 {offsets = [0, 0], sizes = [8, 16], strides = [1, 1]} : vector<16x32xf32> to vector<8x16xf32>
    %274 = vector.extract_strided_slice %266 {offsets = [0, 0], sizes = [8, 16], strides = [1, 1]} : vector<16x32xf32> to vector<8x16xf32>
    %cst_112 = arith.constant dense<0.000000e+00> : vector<8x8xf32>
    %275 = tpu.matmul %272, %273, %cst_112 {dimension_numbers = #tpu.dot_dimension_numbers<[1], [1], [0], [0], [0, 0, 1, 0], [], []>} : vector<8x16xf32>, vector<8x16xf32>, vector<8x8xf32> -> vector<8x8xf32>
    %cst_113 = arith.constant 2.500000e-01 : f32
    %276 = vector.broadcast %cst_113 : f32 to vector<8x8xf32>
    %277 = arith.mulf %275, %276 : vector<8x8xf32>
    %278 = vector.broadcast %271 : vector<1x8xf32> to vector<8x8xf32>
    %279 = arith.addf %277, %278 : vector<8x8xf32>
    %cst_114 = arith.constant dense<0xFF800000> : vector<8xf32>
    %280 = vector.multi_reduction <maximumf>, %279, %cst_114 [1] : vector<8x8xf32> to vector<8xf32>
    %281 = vector.shape_cast %280 : vector<8xf32> to vector<8x1xf32>
    %282 = vector.broadcast %281 : vector<8x1xf32> to vector<8x8xf32>
    %283 = arith.subf %279, %282 : vector<8x8xf32>
    %284 = math.exp %283 : vector<8x8xf32>
    %cst_115 = arith.constant dense<0.000000e+00> : vector<8xf32>
    %285 = vector.multi_reduction <add>, %284, %cst_115 [1] : vector<8x8xf32> to vector<8xf32>
    %286 = vector.shape_cast %285 : vector<8xf32> to vector<8x1xf32>
    %287 = tpu.reciprocal %286 {approx = true} : vector<8x1xf32> -> vector<8x1xf32>
    %288 = vector.broadcast %287 : vector<8x1xf32> to vector<8x8xf32>
    %289 = arith.mulf %284, %288 : vector<8x8xf32>
    %cst_116 = arith.constant dense<0.000000e+00> : vector<8x16xf32>
    %290 = tpu.matmul %289, %274, %cst_116 {dimension_numbers = #tpu.dot_dimension_numbers<[1], [0], [0], [1], [0, 0, 1, 1], [], []>} : vector<8x8xf32>, vector<8x16xf32>, vector<8x16xf32> -> vector<8x16xf32>
    %291 = vector.extract_strided_slice %268 {offsets = [0, 0], sizes = [16, 32], strides = [1, 1]} : vector<32x32xf32> to vector<16x32xf32>
    %cst_117 = arith.constant dense<0.000000e+00> : vector<8x32xf32>
    %292 = tpu.matmul %290, %291, %cst_117 {dimension_numbers = #tpu.dot_dimension_numbers<[1], [0], [0], [1], [0, 0, 1, 1], [], []>} : vector<8x16xf32>, vector<16x32xf32>, vector<8x32xf32> -> vector<8x32xf32>
    %293 = vector.extract_strided_slice %264 {offsets = [0, 16], sizes = [8, 16], strides = [1, 1]} : vector<16x32xf32> to vector<8x16xf32>
    %294 = vector.extract_strided_slice %265 {offsets = [0, 16], sizes = [8, 16], strides = [1, 1]} : vector<16x32xf32> to vector<8x16xf32>
    %295 = vector.extract_strided_slice %266 {offsets = [0, 16], sizes = [8, 16], strides = [1, 1]} : vector<16x32xf32> to vector<8x16xf32>
    %cst_118 = arith.constant dense<0.000000e+00> : vector<8x8xf32>
    %296 = tpu.matmul %293, %294, %cst_118 {dimension_numbers = #tpu.dot_dimension_numbers<[1], [1], [0], [0], [0, 0, 1, 0], [], []>} : vector<8x16xf32>, vector<8x16xf32>, vector<8x8xf32> -> vector<8x8xf32>
    %cst_119 = arith.constant 2.500000e-01 : f32
    %297 = vector.broadcast %cst_119 : f32 to vector<8x8xf32>
    %298 = arith.mulf %296, %297 : vector<8x8xf32>
    %299 = vector.broadcast %271 : vector<1x8xf32> to vector<8x8xf32>
    %300 = arith.addf %298, %299 : vector<8x8xf32>
    %cst_120 = arith.constant dense<0xFF800000> : vector<8xf32>
    %301 = vector.multi_reduction <maximumf>, %300, %cst_120 [1] : vector<8x8xf32> to vector<8xf32>
    %302 = vector.shape_cast %301 : vector<8xf32> to vector<8x1xf32>
    %303 = vector.broadcast %302 : vector<8x1xf32> to vector<8x8xf32>
    %304 = arith.subf %300, %303 : vector<8x8xf32>
    %305 = math.exp %304 : vector<8x8xf32>
    %cst_121 = arith.constant dense<0.000000e+00> : vector<8xf32>
    %306 = vector.multi_reduction <add>, %305, %cst_121 [1] : vector<8x8xf32> to vector<8xf32>
    %307 = vector.shape_cast %306 : vector<8xf32> to vector<8x1xf32>
    %308 = tpu.reciprocal %307 {approx = true} : vector<8x1xf32> -> vector<8x1xf32>
    %309 = vector.broadcast %308 : vector<8x1xf32> to vector<8x8xf32>
    %310 = arith.mulf %305, %309 : vector<8x8xf32>
    %cst_122 = arith.constant dense<0.000000e+00> : vector<8x16xf32>
    %311 = tpu.matmul %310, %295, %cst_122 {dimension_numbers = #tpu.dot_dimension_numbers<[1], [0], [0], [1], [0, 0, 1, 1], [], []>} : vector<8x8xf32>, vector<8x16xf32>, vector<8x16xf32> -> vector<8x16xf32>
    %312 = vector.extract_strided_slice %268 {offsets = [16, 0], sizes = [16, 32], strides = [1, 1]} : vector<32x32xf32> to vector<16x32xf32>
    %cst_123 = arith.constant dense<0.000000e+00> : vector<8x32xf32>
    %313 = tpu.matmul %311, %312, %cst_123 {dimension_numbers = #tpu.dot_dimension_numbers<[1], [0], [0], [1], [0, 0, 1, 1], [], []>} : vector<8x16xf32>, vector<16x32xf32>, vector<8x32xf32> -> vector<8x32xf32>
    %314 = arith.addf %292, %313 : vector<8x32xf32>
    %315 = vector.broadcast %270 : vector<1x32xf32> to vector<8x32xf32>
    %316 = arith.addf %314, %315 : vector<8x32xf32>
    %317 = vector.extract_strided_slice %64 {offsets = [1, 0], sizes = [1, 8], strides = [1, 1]} : vector<2x8xf32> to vector<1x8xf32>
    %318 = vector.extract_strided_slice %264 {offsets = [8, 0], sizes = [8, 16], strides = [1, 1]} : vector<16x32xf32> to vector<8x16xf32>
    %319 = vector.extract_strided_slice %265 {offsets = [8, 0], sizes = [8, 16], strides = [1, 1]} : vector<16x32xf32> to vector<8x16xf32>
    %320 = vector.extract_strided_slice %266 {offsets = [8, 0], sizes = [8, 16], strides = [1, 1]} : vector<16x32xf32> to vector<8x16xf32>
    %cst_124 = arith.constant dense<0.000000e+00> : vector<8x8xf32>
    %321 = tpu.matmul %318, %319, %cst_124 {dimension_numbers = #tpu.dot_dimension_numbers<[1], [1], [0], [0], [0, 0, 1, 0], [], []>} : vector<8x16xf32>, vector<8x16xf32>, vector<8x8xf32> -> vector<8x8xf32>
    %cst_125 = arith.constant 2.500000e-01 : f32
    %322 = vector.broadcast %cst_125 : f32 to vector<8x8xf32>
    %323 = arith.mulf %321, %322 : vector<8x8xf32>
    %324 = vector.broadcast %317 : vector<1x8xf32> to vector<8x8xf32>
    %325 = arith.addf %323, %324 : vector<8x8xf32>
    %cst_126 = arith.constant dense<0xFF800000> : vector<8xf32>
    %326 = vector.multi_reduction <maximumf>, %325, %cst_126 [1] : vector<8x8xf32> to vector<8xf32>
    %327 = vector.shape_cast %326 : vector<8xf32> to vector<8x1xf32>
    %328 = vector.broadcast %327 : vector<8x1xf32> to vector<8x8xf32>
    %329 = arith.subf %325, %328 : vector<8x8xf32>
    %330 = math.exp %329 : vector<8x8xf32>
    %cst_127 = arith.constant dense<0.000000e+00> : vector<8xf32>
    %331 = vector.multi_reduction <add>, %330, %cst_127 [1] : vector<8x8xf32> to vector<8xf32>
    %332 = vector.shape_cast %331 : vector<8xf32> to vector<8x1xf32>
    %333 = tpu.reciprocal %332 {approx = true} : vector<8x1xf32> -> vector<8x1xf32>
    %334 = vector.broadcast %333 : vector<8x1xf32> to vector<8x8xf32>
    %335 = arith.mulf %330, %334 : vector<8x8xf32>
    %cst_128 = arith.constant dense<0.000000e+00> : vector<8x16xf32>
    %336 = tpu.matmul %335, %320, %cst_128 {dimension_numbers = #tpu.dot_dimension_numbers<[1], [0], [0], [1], [0, 0, 1, 1], [], []>} : vector<8x8xf32>, vector<8x16xf32>, vector<8x16xf32> -> vector<8x16xf32>
    %337 = vector.extract_strided_slice %268 {offsets = [0, 0], sizes = [16, 32], strides = [1, 1]} : vector<32x32xf32> to vector<16x32xf32>
    %cst_129 = arith.constant dense<0.000000e+00> : vector<8x32xf32>
    %338 = tpu.matmul %336, %337, %cst_129 {dimension_numbers = #tpu.dot_dimension_numbers<[1], [0], [0], [1], [0, 0, 1, 1], [], []>} : vector<8x16xf32>, vector<16x32xf32>, vector<8x32xf32> -> vector<8x32xf32>
    %339 = vector.extract_strided_slice %264 {offsets = [8, 16], sizes = [8, 16], strides = [1, 1]} : vector<16x32xf32> to vector<8x16xf32>
    %340 = vector.extract_strided_slice %265 {offsets = [8, 16], sizes = [8, 16], strides = [1, 1]} : vector<16x32xf32> to vector<8x16xf32>
    %341 = vector.extract_strided_slice %266 {offsets = [8, 16], sizes = [8, 16], strides = [1, 1]} : vector<16x32xf32> to vector<8x16xf32>
    %cst_130 = arith.constant dense<0.000000e+00> : vector<8x8xf32>
    %342 = tpu.matmul %339, %340, %cst_130 {dimension_numbers = #tpu.dot_dimension_numbers<[1], [1], [0], [0], [0, 0, 1, 0], [], []>} : vector<8x16xf32>, vector<8x16xf32>, vector<8x8xf32> -> vector<8x8xf32>
    %cst_131 = arith.constant 2.500000e-01 : f32
    %343 = vector.broadcast %cst_131 : f32 to vector<8x8xf32>
    %344 = arith.mulf %342, %343 : vector<8x8xf32>
    %345 = vector.broadcast %317 : vector<1x8xf32> to vector<8x8xf32>
    %346 = arith.addf %344, %345 : vector<8x8xf32>
    %cst_132 = arith.constant dense<0xFF800000> : vector<8xf32>
    %347 = vector.multi_reduction <maximumf>, %346, %cst_132 [1] : vector<8x8xf32> to vector<8xf32>
    %348 = vector.shape_cast %347 : vector<8xf32> to vector<8x1xf32>
    %349 = vector.broadcast %348 : vector<8x1xf32> to vector<8x8xf32>
    %350 = arith.subf %346, %349 : vector<8x8xf32>
    %351 = math.exp %350 : vector<8x8xf32>
    %cst_133 = arith.constant dense<0.000000e+00> : vector<8xf32>
    %352 = vector.multi_reduction <add>, %351, %cst_133 [1] : vector<8x8xf32> to vector<8xf32>
    %353 = vector.shape_cast %352 : vector<8xf32> to vector<8x1xf32>
    %354 = tpu.reciprocal %353 {approx = true} : vector<8x1xf32> -> vector<8x1xf32>
    %355 = vector.broadcast %354 : vector<8x1xf32> to vector<8x8xf32>
    %356 = arith.mulf %351, %355 : vector<8x8xf32>
    %cst_134 = arith.constant dense<0.000000e+00> : vector<8x16xf32>
    %357 = tpu.matmul %356, %341, %cst_134 {dimension_numbers = #tpu.dot_dimension_numbers<[1], [0], [0], [1], [0, 0, 1, 1], [], []>} : vector<8x8xf32>, vector<8x16xf32>, vector<8x16xf32> -> vector<8x16xf32>
    %358 = vector.extract_strided_slice %268 {offsets = [16, 0], sizes = [16, 32], strides = [1, 1]} : vector<32x32xf32> to vector<16x32xf32>
    %cst_135 = arith.constant dense<0.000000e+00> : vector<8x32xf32>
    %359 = tpu.matmul %357, %358, %cst_135 {dimension_numbers = #tpu.dot_dimension_numbers<[1], [0], [0], [1], [0, 0, 1, 1], [], []>} : vector<8x16xf32>, vector<16x32xf32>, vector<8x32xf32> -> vector<8x32xf32>
    %360 = arith.addf %338, %359 : vector<8x32xf32>
    %361 = vector.broadcast %270 : vector<1x32xf32> to vector<8x32xf32>
    %362 = arith.addf %360, %361 : vector<8x32xf32>
    %363 = tpu.concatenate %316, %362 in 0 : vector<8x32xf32>, vector<8x32xf32> -> vector<16x32xf32>
    %364 = arith.addf %363, %256 : vector<16x32xf32>
    %c1_136 = arith.constant 1 : index
    %c0_137 = arith.constant 0 : index
    %c0_138 = arith.constant 0 : index
    %365 = vector.load %arg13[%c1_136, %c0_137, %c0_138] : memref<2x1x32xf32, #tpu.memory_space<vmem>>, vector<1x1x32xf32>
    %366 = vector.shape_cast %365 : vector<1x1x32xf32> to vector<1x32xf32>
    %c1_139 = arith.constant 1 : index
    %c0_140 = arith.constant 0 : index
    %c0_141 = arith.constant 0 : index
    %367 = vector.load %arg14[%c1_139, %c0_140, %c0_141] : memref<2x1x32xf32, #tpu.memory_space<vmem>>, vector<1x1x32xf32>
    %368 = vector.shape_cast %367 : vector<1x1x32xf32> to vector<1x32xf32>
    %cst_142 = arith.constant dense<0.000000e+00> : vector<16xf32>
    %369 = vector.multi_reduction <add>, %364, %cst_142 [1] : vector<16x32xf32> to vector<16xf32>
    %370 = vector.shape_cast %369 : vector<16xf32> to vector<16x1xf32>
    %cst_143 = arith.constant 3.200000e+01 : f32
    %371 = vector.broadcast %cst_143 : f32 to vector<16x1xf32>
    %372 = arith.divf %370, %371 : vector<16x1xf32>
    %373 = vector.broadcast %372 : vector<16x1xf32> to vector<16x32xf32>
    %374 = arith.subf %364, %373 : vector<16x32xf32>
    %375 = vector.broadcast %372 : vector<16x1xf32> to vector<16x32xf32>
    %376 = arith.subf %364, %375 : vector<16x32xf32>
    %377 = arith.mulf %374, %376 : vector<16x32xf32>
    %cst_144 = arith.constant dense<0.000000e+00> : vector<16xf32>
    %378 = vector.multi_reduction <add>, %377, %cst_144 [1] : vector<16x32xf32> to vector<16xf32>
    %379 = vector.shape_cast %378 : vector<16xf32> to vector<16x1xf32>
    %cst_145 = arith.constant 3.200000e+01 : f32
    %380 = vector.broadcast %cst_145 : f32 to vector<16x1xf32>
    %381 = arith.divf %379, %380 : vector<16x1xf32>
    %382 = vector.broadcast %372 : vector<16x1xf32> to vector<16x32xf32>
    %383 = arith.subf %364, %382 : vector<16x32xf32>
    %cst_146 = arith.constant 9.99999997E-7 : f32
    %384 = vector.broadcast %cst_146 : f32 to vector<16x1xf32>
    %385 = arith.addf %381, %384 : vector<16x1xf32>
    %386 = math.rsqrt %385 : vector<16x1xf32>
    %387 = vector.broadcast %386 : vector<16x1xf32> to vector<16x32xf32>
    %388 = arith.mulf %383, %387 : vector<16x32xf32>
    %389 = vector.broadcast %366 : vector<1x32xf32> to vector<16x32xf32>
    %390 = arith.mulf %388, %389 : vector<16x32xf32>
    %391 = vector.broadcast %368 : vector<1x32xf32> to vector<16x32xf32>
    %392 = arith.addf %390, %391 : vector<16x32xf32>
    %c1_147 = arith.constant 1 : index
    %c0_148 = arith.constant 0 : index
    %c0_149 = arith.constant 0 : index
    %393 = vector.load %arg15[%c1_147, %c0_148, %c0_149] : memref<2x32x64xf32, #tpu.memory_space<vmem>>, vector<1x32x64xf32>
    %394 = vector.shape_cast %393 : vector<1x32x64xf32> to vector<32x64xf32>
    %cst_150 = arith.constant dense<0.000000e+00> : vector<16x64xf32>
    %395 = tpu.matmul %392, %394, %cst_150 {dimension_numbers = #tpu.dot_dimension_numbers<[1], [0], [0], [1], [0, 0, 1, 1], [], []>} : vector<16x32xf32>, vector<32x64xf32>, vector<16x64xf32> -> vector<16x64xf32>
    %c1_151 = arith.constant 1 : index
    %c0_152 = arith.constant 0 : index
    %c0_153 = arith.constant 0 : index
    %396 = vector.load %arg16[%c1_151, %c0_152, %c0_153] : memref<2x1x64xf32, #tpu.memory_space<vmem>>, vector<1x1x64xf32>
    %397 = vector.shape_cast %396 : vector<1x1x64xf32> to vector<1x64xf32>
    %398 = vector.broadcast %397 : vector<1x64xf32> to vector<16x64xf32>
    %399 = arith.addf %395, %398 : vector<16x64xf32>
    %400 = arith.mulf %399, %399 : vector<16x64xf32>
    %401 = arith.mulf %399, %400 : vector<16x64xf32>
    %cst_154 = arith.constant 4.471500e-02 : f32
    %402 = vector.broadcast %cst_154 : f32 to vector<16x64xf32>
    %403 = arith.mulf %402, %401 : vector<16x64xf32>
    %404 = arith.addf %399, %403 : vector<16x64xf32>
    %cst_155 = arith.constant 0.797884583 : f32
    %405 = vector.broadcast %cst_155 : f32 to vector<16x64xf32>
    %406 = arith.mulf %405, %404 : vector<16x64xf32>
    %407 = math.tanh %406 : vector<16x64xf32>
    %cst_156 = arith.constant 1.000000e+00 : f32
    %408 = vector.broadcast %cst_156 : f32 to vector<16x64xf32>
    %409 = arith.addf %408, %407 : vector<16x64xf32>
    %cst_157 = arith.constant 5.000000e-01 : f32
    %410 = vector.broadcast %cst_157 : f32 to vector<16x64xf32>
    %411 = arith.mulf %410, %409 : vector<16x64xf32>
    %412 = arith.mulf %399, %411 : vector<16x64xf32>
    %c1_158 = arith.constant 1 : index
    %c0_159 = arith.constant 0 : index
    %c0_160 = arith.constant 0 : index
    %413 = vector.load %arg17[%c1_158, %c0_159, %c0_160] : memref<2x64x32xf32, #tpu.memory_space<vmem>>, vector<1x64x32xf32>
    %414 = vector.shape_cast %413 : vector<1x64x32xf32> to vector<64x32xf32>
    %cst_161 = arith.constant dense<0.000000e+00> : vector<16x32xf32>
    %415 = tpu.matmul %412, %414, %cst_161 {dimension_numbers = #tpu.dot_dimension_numbers<[1], [0], [0], [1], [0, 0, 1, 1], [], []>} : vector<16x64xf32>, vector<64x32xf32>, vector<16x32xf32> -> vector<16x32xf32>
    %c1_162 = arith.constant 1 : index
    %c0_163 = arith.constant 0 : index
    %c0_164 = arith.constant 0 : index
    %416 = vector.load %arg18[%c1_162, %c0_163, %c0_164] : memref<2x1x32xf32, #tpu.memory_space<vmem>>, vector<1x1x32xf32>
    %417 = vector.shape_cast %416 : vector<1x1x32xf32> to vector<1x32xf32>
    %418 = vector.broadcast %417 : vector<1x32xf32> to vector<16x32xf32>
    %419 = arith.addf %415, %418 : vector<16x32xf32>
    %420 = arith.addf %419, %392 : vector<16x32xf32>
    %c1_165 = arith.constant 1 : index
    %c0_166 = arith.constant 0 : index
    %c0_167 = arith.constant 0 : index
    %421 = vector.load %arg19[%c1_165, %c0_166, %c0_167] : memref<2x1x32xf32, #tpu.memory_space<vmem>>, vector<1x1x32xf32>
    %422 = vector.shape_cast %421 : vector<1x1x32xf32> to vector<1x32xf32>
    %c1_168 = arith.constant 1 : index
    %c0_169 = arith.constant 0 : index
    %c0_170 = arith.constant 0 : index
    %423 = vector.load %arg20[%c1_168, %c0_169, %c0_170] : memref<2x1x32xf32, #tpu.memory_space<vmem>>, vector<1x1x32xf32>
    %424 = vector.shape_cast %423 : vector<1x1x32xf32> to vector<1x32xf32>
    %cst_171 = arith.constant dense<0.000000e+00> : vector<16xf32>
    %425 = vector.multi_reduction <add>, %420, %cst_171 [1] : vector<16x32xf32> to vector<16xf32>
    %426 = vector.shape_cast %425 : vector<16xf32> to vector<16x1xf32>
    %cst_172 = arith.constant 3.200000e+01 : f32
    %427 = vector.broadcast %cst_172 : f32 to vector<16x1xf32>
    %428 = arith.divf %426, %427 : vector<16x1xf32>
    %429 = vector.broadcast %428 : vector<16x1xf32> to vector<16x32xf32>
    %430 = arith.subf %420, %429 : vector<16x32xf32>
    %431 = vector.broadcast %428 : vector<16x1xf32> to vector<16x32xf32>
    %432 = arith.subf %420, %431 : vector<16x32xf32>
    %433 = arith.mulf %430, %432 : vector<16x32xf32>
    %cst_173 = arith.constant dense<0.000000e+00> : vector<16xf32>
    %434 = vector.multi_reduction <add>, %433, %cst_173 [1] : vector<16x32xf32> to vector<16xf32>
    %435 = vector.shape_cast %434 : vector<16xf32> to vector<16x1xf32>
    %cst_174 = arith.constant 3.200000e+01 : f32
    %436 = vector.broadcast %cst_174 : f32 to vector<16x1xf32>
    %437 = arith.divf %435, %436 : vector<16x1xf32>
    %438 = vector.broadcast %428 : vector<16x1xf32> to vector<16x32xf32>
    %439 = arith.subf %420, %438 : vector<16x32xf32>
    %cst_175 = arith.constant 9.99999997E-7 : f32
    %440 = vector.broadcast %cst_175 : f32 to vector<16x1xf32>
    %441 = arith.addf %437, %440 : vector<16x1xf32>
    %442 = math.rsqrt %441 : vector<16x1xf32>
    %443 = vector.broadcast %442 : vector<16x1xf32> to vector<16x32xf32>
    %444 = arith.mulf %439, %443 : vector<16x32xf32>
    %445 = vector.broadcast %422 : vector<1x32xf32> to vector<16x32xf32>
    %446 = arith.mulf %444, %445 : vector<16x32xf32>
    %447 = vector.broadcast %424 : vector<1x32xf32> to vector<16x32xf32>
    %448 = arith.addf %446, %447 : vector<16x32xf32>
    %c0_176 = arith.constant 0 : index
    %c0_177 = arith.constant 0 : index
    %449 = vector.load %arg21[%c0_176, %c0_177] : memref<32x32xf32, #tpu.memory_space<vmem>>, vector<32x32xf32>
    %cst_178 = arith.constant dense<0.000000e+00> : vector<16x32xf32>
    %450 = tpu.matmul %448, %449, %cst_178 {dimension_numbers = #tpu.dot_dimension_numbers<[1], [0], [0], [1], [0, 0, 1, 1], [], []>} : vector<16x32xf32>, vector<32x32xf32>, vector<16x32xf32> -> vector<16x32xf32>
    %c0_179 = arith.constant 0 : index
    %c0_180 = arith.constant 0 : index
    %451 = vector.load %arg22[%c0_179, %c0_180] : memref<1x32xf32, #tpu.memory_space<vmem>>, vector<1x32xf32>
    %452 = vector.broadcast %451 : vector<1x32xf32> to vector<16x32xf32>
    %453 = arith.addf %450, %452 : vector<16x32xf32>
    %454 = arith.mulf %453, %453 : vector<16x32xf32>
    %455 = arith.mulf %453, %454 : vector<16x32xf32>
    %cst_181 = arith.constant 4.471500e-02 : f32
    %456 = vector.broadcast %cst_181 : f32 to vector<16x32xf32>
    %457 = arith.mulf %456, %455 : vector<16x32xf32>
    %458 = arith.addf %453, %457 : vector<16x32xf32>
    %cst_182 = arith.constant 0.797884583 : f32
    %459 = vector.broadcast %cst_182 : f32 to vector<16x32xf32>
    %460 = arith.mulf %459, %458 : vector<16x32xf32>
    %461 = math.tanh %460 : vector<16x32xf32>
    %cst_183 = arith.constant 1.000000e+00 : f32
    %462 = vector.broadcast %cst_183 : f32 to vector<16x32xf32>
    %463 = arith.addf %462, %461 : vector<16x32xf32>
    %cst_184 = arith.constant 5.000000e-01 : f32
    %464 = vector.broadcast %cst_184 : f32 to vector<16x32xf32>
    %465 = arith.mulf %464, %463 : vector<16x32xf32>
    %466 = arith.mulf %453, %465 : vector<16x32xf32>
    %c0_185 = arith.constant 0 : index
    %c0_186 = arith.constant 0 : index
    %467 = vector.load %arg23[%c0_185, %c0_186] : memref<1x32xf32, #tpu.memory_space<vmem>>, vector<1x32xf32>
    %c0_187 = arith.constant 0 : index
    %c0_188 = arith.constant 0 : index
    %468 = vector.load %arg24[%c0_187, %c0_188] : memref<1x32xf32, #tpu.memory_space<vmem>>, vector<1x32xf32>
    %cst_189 = arith.constant dense<0.000000e+00> : vector<16xf32>
    %469 = vector.multi_reduction <add>, %466, %cst_189 [1] : vector<16x32xf32> to vector<16xf32>
    %470 = vector.shape_cast %469 : vector<16xf32> to vector<16x1xf32>
    %cst_190 = arith.constant 3.200000e+01 : f32
    %471 = vector.broadcast %cst_190 : f32 to vector<16x1xf32>
    %472 = arith.divf %470, %471 : vector<16x1xf32>
    %473 = vector.broadcast %472 : vector<16x1xf32> to vector<16x32xf32>
    %474 = arith.subf %466, %473 : vector<16x32xf32>
    %475 = vector.broadcast %472 : vector<16x1xf32> to vector<16x32xf32>
    %476 = arith.subf %466, %475 : vector<16x32xf32>
    %477 = arith.mulf %474, %476 : vector<16x32xf32>
    %cst_191 = arith.constant dense<0.000000e+00> : vector<16xf32>
    %478 = vector.multi_reduction <add>, %477, %cst_191 [1] : vector<16x32xf32> to vector<16xf32>
    %479 = vector.shape_cast %478 : vector<16xf32> to vector<16x1xf32>
    %cst_192 = arith.constant 3.200000e+01 : f32
    %480 = vector.broadcast %cst_192 : f32 to vector<16x1xf32>
    %481 = arith.divf %479, %480 : vector<16x1xf32>
    %482 = vector.broadcast %472 : vector<16x1xf32> to vector<16x32xf32>
    %483 = arith.subf %466, %482 : vector<16x32xf32>
    %cst_193 = arith.constant 9.99999997E-7 : f32
    %484 = vector.broadcast %cst_193 : f32 to vector<16x1xf32>
    %485 = arith.addf %481, %484 : vector<16x1xf32>
    %486 = math.rsqrt %485 : vector<16x1xf32>
    %487 = vector.broadcast %486 : vector<16x1xf32> to vector<16x32xf32>
    %488 = arith.mulf %483, %487 : vector<16x32xf32>
    %489 = vector.broadcast %467 : vector<1x32xf32> to vector<16x32xf32>
    %490 = arith.mulf %488, %489 : vector<16x32xf32>
    %491 = vector.broadcast %468 : vector<1x32xf32> to vector<16x32xf32>
    %492 = arith.addf %490, %491 : vector<16x32xf32>
    %cst_194 = arith.constant dense<0.000000e+00> : vector<16x64xf32>
    %493 = tpu.matmul %492, %6, %cst_194 {dimension_numbers = #tpu.dot_dimension_numbers<[1], [1], [0], [0], [0, 0, 1, 0], [], []>} : vector<16x32xf32>, vector<64x32xf32>, vector<16x64xf32> -> vector<16x64xf32>
    %c0_195 = arith.constant 0 : index
    %c0_196 = arith.constant 0 : index
    %494 = vector.load %arg25[%c0_195, %c0_196] : memref<1x64xf32, #tpu.memory_space<vmem>>, vector<1x64xf32>
    %495 = vector.broadcast %494 : vector<1x64xf32> to vector<16x64xf32>
    %496 = arith.addf %493, %495 : vector<16x64xf32>
    %c0_197 = arith.constant 0 : index
    %c0_198 = arith.constant 0 : index
    %497 = vector.load %arg3[%c0_197, %c0_198] : memref<16x1xi32, #tpu.memory_space<vmem>>, vector<16x1xi32>
    %498 = vector.broadcast %497 : vector<16x1xi32> to vector<16x64xi32>
    %499 = arith.cmpi eq, %1, %498 : vector<16x64xi32>
    %500 = arith.extui %499 : vector<16x64xi1> to vector<16x64xi32>
    %501 = arith.sitofp %500 : vector<16x64xi32> to vector<16x64xf32>
    %c0_i32_199 = arith.constant 0 : i32
    %502 = vector.broadcast %c0_i32_199 : i32 to vector<16x1xi32>
    %503 = arith.cmpi sgt, %497, %502 : vector<16x1xi32>
    %504 = arith.extui %503 : vector<16x1xi1> to vector<16x1xi32>
    %505 = arith.sitofp %504 : vector<16x1xi32> to vector<16x1xf32>
    %cst_200 = arith.constant dense<0xFF800000> : vector<16xf32>
    %506 = vector.multi_reduction <maximumf>, %496, %cst_200 [1] : vector<16x64xf32> to vector<16xf32>
    %507 = vector.shape_cast %506 : vector<16xf32> to vector<16x1xf32>
    %508 = vector.broadcast %507 : vector<16x1xf32> to vector<16x64xf32>
    %509 = arith.subf %496, %508 : vector<16x64xf32>
    %510 = math.exp %509 : vector<16x64xf32>
    %cst_201 = arith.constant dense<0.000000e+00> : vector<16xf32>
    %511 = vector.multi_reduction <add>, %510, %cst_201 [1] : vector<16x64xf32> to vector<16xf32>
    %512 = vector.shape_cast %511 : vector<16xf32> to vector<16x1xf32>
    %513 = math.log %512 : vector<16x1xf32>
    %514 = arith.addf %513, %507 : vector<16x1xf32>
    %515 = vector.broadcast %514 : vector<16x1xf32> to vector<16x64xf32>
    %516 = arith.subf %496, %515 : vector<16x64xf32>
    %517 = arith.mulf %516, %501 : vector<16x64xf32>
    %cst_202 = arith.constant dense<0.000000e+00> : vector<16xf32>
    %518 = vector.multi_reduction <add>, %517, %cst_202 [1] : vector<16x64xf32> to vector<16xf32>
    %519 = vector.shape_cast %518 : vector<16xf32> to vector<16x1xf32>
    %cst_203 = arith.constant 0.000000e+00 : f32
    %520 = vector.broadcast %cst_203 : f32 to vector<16x1xf32>
    %521 = arith.subf %520, %519 : vector<16x1xf32>
    %522 = vector.shape_cast %505 : vector<16x1xf32> to vector<1x16x1xf32>
    %cst_204 = arith.constant dense<0.000000e+00> : vector<1xf32>
    %523 = vector.multi_reduction <add>, %522, %cst_204 [1, 2] : vector<1x16x1xf32> to vector<1xf32>
    %524 = vector.shape_cast %523 : vector<1xf32> to vector<1x1x1xf32>
    %525 = vector.extract %524[0, 0, 0] : f32 from vector<1x1x1xf32>
    %526 = vector.broadcast %525 : f32 to vector<1x1xf32>
    %cst_205 = arith.constant 9.99999997E-7 : f32
    %527 = vector.broadcast %cst_205 : f32 to vector<1x1xf32>
    %528 = arith.addf %526, %527 : vector<1x1xf32>
    %529 = arith.mulf %521, %505 : vector<16x1xf32>
    %530 = vector.shape_cast %529 : vector<16x1xf32> to vector<1x16x1xf32>
    %cst_206 = arith.constant dense<0.000000e+00> : vector<1xf32>
    %531 = vector.multi_reduction <add>, %530, %cst_206 [1, 2] : vector<1x16x1xf32> to vector<1xf32>
    %532 = vector.shape_cast %531 : vector<1xf32> to vector<1x1x1xf32>
    %533 = vector.extract %532[0, 0, 0] : f32 from vector<1x1x1xf32>
    %534 = vector.broadcast %533 : f32 to vector<1x1xf32>
    %535 = arith.divf %534, %528 : vector<1x1xf32>
    %536 = vector.broadcast %507 : vector<16x1xf32> to vector<16x64xf32>
    %537 = arith.cmpf oge, %496, %536 : vector<16x64xf32>
    %c64_i32 = arith.constant 64 : i32
    %538 = vector.broadcast %c64_i32 : i32 to vector<16x64xi32>
    %539 = arith.select %537, %1, %538 : vector<16x64xi1>, vector<16x64xi32>
    %cst_207 = arith.constant dense<2147483647> : vector<16xi32>
    %540 = vector.multi_reduction <minsi>, %539, %cst_207 [1] : vector<16x64xi32> to vector<16xi32>
    %541 = vector.shape_cast %540 : vector<16xi32> to vector<16x1xi32>
    %542 = arith.cmpi eq, %541, %497 : vector<16x1xi32>
    %543 = arith.extui %542 : vector<16x1xi1> to vector<16x1xi32>
    %544 = arith.sitofp %543 : vector<16x1xi32> to vector<16x1xf32>
    %545 = arith.mulf %544, %505 : vector<16x1xf32>
    %546 = vector.shape_cast %545 : vector<16x1xf32> to vector<1x16x1xf32>
    %cst_208 = arith.constant dense<0.000000e+00> : vector<1xf32>
    %547 = vector.multi_reduction <add>, %546, %cst_208 [1, 2] : vector<1x16x1xf32> to vector<1xf32>
    %548 = vector.shape_cast %547 : vector<1xf32> to vector<1x1x1xf32>
    %549 = vector.extract %548[0, 0, 0] : f32 from vector<1x1x1xf32>
    %550 = vector.broadcast %549 : f32 to vector<1x1xf32>
    %551 = tpu.iota {dimensions = array<i32: 1>} : vector<1x128xi32>
    %c0_i32_209 = arith.constant 0 : i32
    %552 = vector.broadcast %c0_i32_209 : i32 to vector<1x128xi32>
    %553 = arith.cmpi eq, %551, %552 : vector<1x128xi32>
    %cst_210 = arith.constant 0.000000e+00 : f32
    %554 = vector.shape_cast %535 : vector<1x1xf32> to vector<1x1xf32>
    %555 = vector.broadcast %554 : vector<1x1xf32> to vector<1x128xf32>
    %556 = vector.broadcast %cst_210 : f32 to vector<1x128xf32>
    %557 = arith.select %553, %555, %556 : vector<1x128xi1>, vector<1x128xf32>
    %c1_i32_211 = arith.constant 1 : i32
    %558 = vector.broadcast %c1_i32_211 : i32 to vector<1x128xi32>
    %559 = arith.cmpi eq, %551, %558 : vector<1x128xi32>
    %cst_212 = arith.constant 0.000000e+00 : f32
    %560 = vector.shape_cast %550 : vector<1x1xf32> to vector<1x1xf32>
    %561 = vector.broadcast %560 : vector<1x1xf32> to vector<1x128xf32>
    %562 = vector.broadcast %cst_212 : f32 to vector<1x128xf32>
    %563 = arith.select %559, %561, %562 : vector<1x128xi1>, vector<1x128xf32>
    %564 = arith.addf %557, %563 : vector<1x128xf32>
    %c2_i32 = arith.constant 2 : i32
    %565 = vector.broadcast %c2_i32 : i32 to vector<1x128xi32>
    %566 = arith.cmpi eq, %551, %565 : vector<1x128xi32>
    %cst_213 = arith.constant 0.000000e+00 : f32
    %567 = vector.shape_cast %528 : vector<1x1xf32> to vector<1x1xf32>
    %568 = vector.broadcast %567 : vector<1x1xf32> to vector<1x128xf32>
    %569 = vector.broadcast %cst_213 : f32 to vector<1x128xf32>
    %570 = arith.select %566, %568, %569 : vector<1x128xi1>, vector<1x128xf32>
    %571 = arith.addf %564, %570 : vector<1x128xf32>
    %c0_214 = arith.constant 0 : index
    %c0_215 = arith.constant 0 : index
    %572 = vector.load %arg26[%c0_214, %c0_215] : memref<1x128xf32, #tpu.memory_space<vmem>>, vector<1x128xf32>
    tpu.vector_store %arg26[%c0_214, %c0_215], %571 {strides = array<i32>} : memref<1x128xf32, #tpu.memory_space<vmem>>, vector<1x128xf32>,
    return
  }
}

</mosaic_0001>

<bundles_post_ra>
// kernel: model_forward.1
= control target key start
LH: loop header
LB: loop body
LE: loop exit
PB: predicated region body
PF: predicated region fallthrough
CT: control target
= control target key end

     0   :  { %s5082_s0 = inlined_call_operand.vmem [shape: s32[16,1], index: 0, kind: input, shape index: {}]   ;;  %s5083_s1 = inlined_call_operand.vmem [shape: s32[16,1], index: 1, kind: input, shape index: {}]   ;;  %s5084_s2 = inlined_call_operand.vmem [shape: s32[2,8], index: 2, kind: input, shape index: {}]   ;;  %s5085_s3 = inlined_call_operand.vmem [shape: s32[16,1], index: 3, kind: input, shape index: {}]   ;;  %s5086_s4 = inlined_call_operand.hbm [shape: f32[64,32], index: 4, kind: input, shape index: {}]   ;;  %s5087_s5 = inlined_call_operand.hbm [shape: f32[64,32], index: 5, kind: input, shape index: {}]   ;;  %s5088_s6 = inlined_call_operand.vmem [shape: f32[3,32], index: 6, kind: input, shape index: {}]   ;;  %s5089_s7 = inlined_call_operand.vmem [shape: f32[1,32], index: 7, kind: input, shape index: {}, may-alias: {7,23}]   ;;  %s5090_s8 = inlined_call_operand.vmem [shape: f32[1,32], index: 8, kind: input, shape index: {}, may-alias: {8,22,24}]   ;;  %s5091_s9 = inlined_call_operand.hbm [shape: f32[2,32,96], index: 9, kind: input, shape index: {}]   ;;  %s5092_s10 = inlined_call_operand.vmem [shape: f32[2,1,96], index: 10, kind: input, shape index: {}]   ;;  %s5093_s11 = inlined_call_operand.hbm [shape: f32[2,32,32], index: 11, kind: input, shape index: {}]   ;;  %s5094_s12 = inlined_call_operand.vmem [shape: f32[2,1,32], index: 12, kind: input, shape index: {}, may-alias: {12,14,18,20}]   ;;  %s5095_s13 = inlined_call_operand.vmem [shape: f32[2,1,32], index: 13, kind: input, shape index: {}, may-alias: {13,19}]   ;;  %s5096_s14 = inlined_call_operand.vmem [shape: f32[2,1,32], index: 14, kind: input, shape index: {}, may-alias: {12,14,18,20}]   ;;  %s5097_s15 = inlined_call_operand.vmem [shape: f32[2,32,64], index: 15, kind: input, shape index: {}]   ;;  %s5098_s16 = inlined_call_operand.vmem [shape: f32[2,1,64], index: 16, kind: input, shape index: {}]   ;;  %s5099_s17 = inlined_call_operand.hbm [shape: f32[2,64,32], index: 17, kind: input, shape index: {}]   ;;  %s5100_s18 = inlined_call_operand.vmem [shape: f32[2,1,32], index: 18, kind: input, shape index: {}, may-alias: {12,14,18,20}]   ;;  %s5101_s19 = inlined_call_operand.vmem [shape: f32[2,1,32], index: 19, kind: input, shape index: {}, may-alias: {13,19}]   ;;  %s5102_s20 = inlined_call_operand.vmem [shape: f32[2,1,32], index: 20, kind: input, shape index: {}, may-alias: {12,14,18,20}]   ;;  %s5103_s21 = inlined_call_operand.vmem [shape: f32[32,32], index: 21, kind: input, shape index: {}]   ;;  %s5104_s22 = inlined_call_operand.vmem [shape: f32[1,32], index: 22, kind: input, shape index: {}, may-alias: {8,22,24}]   ;;  %s5105_s23 = inlined_call_operand.vmem [shape: f32[1,32], index: 23, kind: input, shape index: {}, may-alias: {7,23}]   ;;  %s5106_s24 = inlined_call_operand.vmem [shape: f32[1,32], index: 24, kind: input, shape index: {}, may-alias: {8,22,24}]   ;;  %s5107_s25 = inlined_call_operand.vmem [shape: f32[1,64], index: 25, kind: input, shape index: {}]   ;;  %s5108_s26 = inlined_call_operand.vmem [shape: f32[1,128], index: 26, kind: output, shape index: {}]  }
   0x1   :  { %5116 = sst [smem:[#allocation13_spill]] %s5082_s0 }
   0x2   :  { %5117 = sst [smem:[#allocation14_spill]] %s5083_s1 }
   0x3   :  { %5118 = sst [smem:[#allocation15_spill]] %s5084_s2 }
   0x4   :  { %5119 = sst [smem:[#allocation16_spill]] %s5085_s3 }
   0x5   :  { %5120 = sst [smem:[#allocation17_spill]] %s5086_s4 }
   0x6   :  { %5121 = sst [smem:[#allocation18_spill]] %s5087_s5 }
   0x7   :  { %5122 = sst [smem:[#allocation19_spill]] %s5088_s6 }
   0x8   :  { %5123 = sst [smem:[#allocation20_spill]] %s5089_s7 }
   0x9   :  { %5124 = sst [smem:[#allocation21_spill]] %s5090_s8 }
   0xa   :  { %5125 = sst [smem:[#allocation22_spill]] %s5091_s9 }
   0xb   :  { %5126 = sst [smem:[#allocation23_spill]] %s5092_s10 }
   0xc   :  { %5127 = sst [smem:[#allocation24_spill]] %s5107_s25 }
   0xd   :  { %5128 = sst [smem:[#allocation25_spill]] %s5108_s26 }
   0xe   :  { %31 = vsyncpa [#allocation3], 0 }
   0xf   :  { %32 = vsyncpa [#allocation5], 0 }
  0x10   :  { %33 = vsyncpa [#allocation8], 0  ;;  %s4369_s27 = smov [#allocation4]   ;;  %s4370_s7 = smov [#allocation7]  }
  0x11   :  { %s59_s3 = sshll.u32 %s4369_s27, 4  ;;  %s91_s28 = sshll.u32 %s4370_s7, 4  ;;  %s60_s3 = int_to_ptr.vmem [resolvable:$true] %s59_s3  ;;  %s4521_s28 = int_to_ptr.vmem [resolvable:$true] %s91_s28 }
  0x12   :  { %s5129_s29 = sld [smem:[#allocation18_spill]] }
  0x18   :  { %s4253_s0 = scalar_lea.hbm %s5129_s29, 1024 }
  0x19   :  { %p4254_p0 = scmp.ne.s32.totalorder %s5129_s29, %s4253_s0  ;;  %p4257_p1 = scmp.lt.u32.totalorder %s4253_s0, %s5129_s29 }
  0x1b   :  { %p4259_p2 = pnand %p4257_p1, %p4254_p0 }
  0x1d   :  { %4262 = shalt.err (!%p4259_p2)
}
  0x1e   :  { %s4263_s10 = scalar_lea.vmem %s60_s3, 1024  ;;  %p4268_p4 = scmp.lt.s32.totalorder %s60_s3, %s60_s3 }
  0x1f   :  { %p4264_p3 = scmp.ne.s32.totalorder %s60_s3, %s4263_s10  ;;  %p4269_p5 = scmp.lt.s32.totalorder %s4263_s10, %s4263_s10 }
  0x21   :  { %p4270_p6 = por %p4269_p5, %p4268_p4 }
  0x23   :  { %p4271_p7 = pnand %p4270_p6, %p4264_p3 }
  0x25   :  { %4274 = shalt.err (!%p4271_p7)
}
  0x26   :  { %s4371_s6 = smov 128   ;;  %s4372_s1 = smov 8  }
  0x27   :  { %65 = dma.hbm_to_vmem [thread:$0]  %s5129_s29, 1024, %s60_s3, [#allocation5], %s4371_s6, %s4371_s6, %s4372_s1  }
  0x28   :  { %s4275_s0 = scalar_lea.hbm %s5093_s11, 1024 }
  0x29   :  { %p4276_p8 = scmp.ne.s32.totalorder %s5093_s11, %s4275_s0  ;;  %p4279_p9 = scmp.lt.u32.totalorder %s4275_s0, %s5093_s11 }
  0x2b   :  { %p4281_p10 = pnand %p4279_p9, %p4276_p8 }
  0x2d   :  { %4284 = shalt.err (!%p4281_p10)
}
  0x2e   :  { %s4285_s10 = scalar_lea.vmem %s4521_s28, 1024  ;;  %p4290_p12 = scmp.lt.s32.totalorder %s4521_s28, %s4521_s28 }
  0x2f   :  { %p4286_p11 = scmp.ne.s32.totalorder %s4521_s28, %s4285_s10  ;;  %p4291_p13 = scmp.lt.s32.totalorder %s4285_s10, %s4285_s10 }
  0x31   :  { %p4292_p0 = por %p4291_p13, %p4290_p12 }
  0x33   :  { %p4293_p1 = pnand %p4292_p0, %p4286_p11 }
  0x35   :  { %4296 = shalt.err (!%p4293_p1)
}
  0x36   :  { %97 = dma.hbm_to_vmem [thread:$0]  %s5093_s11, 1024, %s4521_s28, [#allocation8], %s4371_s6, %s4371_s6, %s4372_s1  }
  0x37   :  { %s4373_s27 = smov [#allocation2]   ;;  %s4374_s8 = smov [#allocation6]  }
  0x38   :  { %s47_s7 = sshll.u32 %s4373_s27, 4  ;;  %s77_s4 = sshll.u32 %s4374_s8, 4  ;;  %s48_s7 = int_to_ptr.vmem [resolvable:$true] %s47_s7  ;;  %s4558_s4 = int_to_ptr.vmem [resolvable:$true] %s77_s4 }
  0x39   :  { %s5130_s30 = sld [smem:[#allocation17_spill]] }
  0x3f   :  { %s4297_s2 = scalar_lea.hbm %s5130_s30, 1024 }
  0x40   :  { %p4298_p2 = scmp.ne.s32.totalorder %s5130_s30, %s4297_s2  ;;  %p4301_p3 = scmp.lt.u32.totalorder %s4297_s2, %s5130_s30 }
  0x42   :  { %p4303_p4 = pnand %p4301_p3, %p4298_p2 }
  0x44   :  { %4306 = shalt.err (!%p4303_p4)
}
  0x45   :  { %s4307_s11 = scalar_lea.vmem %s48_s7, 1024  ;;  %p4312_p6 = scmp.lt.s32.totalorder %s48_s7, %s48_s7 }
  0x46   :  { %p4308_p5 = scmp.ne.s32.totalorder %s48_s7, %s4307_s11  ;;  %p4313_p7 = scmp.lt.s32.totalorder %s4307_s11, %s4307_s11 }
  0x48   :  { %p4314_p8 = por %p4313_p7, %p4312_p6 }
  0x4a   :  { %p4315_p9 = pnand %p4314_p8, %p4308_p5 }
  0x4c   :  { %4318 = shalt.err (!%p4315_p9)
}
  0x4d   :  { %53 = dma.hbm_to_vmem [thread:$0]  %s5130_s30, 1024, %s48_s7, [#allocation3], %s4371_s6, %s4371_s6, %s4372_s1  }
  0x4e   :  { %s5131_s25 = sld [smem:[#allocation22_spill]] }
  0x54   :  { %s4319_s26 = scalar_lea.hbm %s5131_s25, 1024 }
  0x55   :  { %p4320_p10 = scmp.ne.s32.totalorder %s5131_s25, %s4319_s26  ;;  %p4323_p11 = scmp.lt.u32.totalorder %s4319_s26, %s5131_s25 }
  0x57   :  { %p4325_p12 = pnand %p4323_p11, %p4320_p10 }
  0x59   :  { %4328 = shalt.err (!%p4325_p12)
}
  0x5a   :  { %s4329_s5 = scalar_lea.vmem %s4558_s4, 1024  ;;  %p4334_p0 = scmp.lt.s32.totalorder %s4558_s4, %s4558_s4 }
  0x5b   :  { %p4330_p13 = scmp.ne.s32.totalorder %s4558_s4, %s4329_s5  ;;  %p4335_p1 = scmp.lt.s32.totalorder %s4329_s5, %s4329_s5 }
  0x5d   :  { %p4336_p2 = por %p4335_p1, %p4334_p0 }
  0x5f   :  { %p4337_p3 = pnand %p4336_p2, %p4330_p13 }
  0x61   :  { %4340 = shalt.err (!%p4337_p3)
}
  0x62   :  { %83 = dma.hbm_to_vmem [thread:$0]  %s5131_s25, 1024, %s4558_s4, [#allocation5], %s4371_s6, %s4371_s6, %s4372_s1  }
  0x63   :  { %s4375_s10 = smov [#allocation9]   ;;  %s4341_s29 = scalar_lea.hbm %s5099_s17, 2048 }
  0x64   :  { %s113_s11 = sshll.u32 %s4375_s10, 4  ;;  %p4342_p4 = scmp.ne.s32.totalorder %s5099_s17, %s4341_s29  ;;  %s114_s11 = int_to_ptr.vmem [resolvable:$true] %s113_s11 }
  0x65   :  { %p4345_p5 = scmp.lt.u32.totalorder %s4341_s29, %s5099_s17 }
  0x67   :  { %p4347_p6 = pnand %p4345_p5, %p4342_p4 }
  0x69   :  { %4350 = shalt.err (!%p4347_p6)
}
  0x6a   :  { %s4351_s9 = scalar_lea.vmem %s114_s11, 2048  ;;  %p4356_p8 = scmp.lt.s32.totalorder %s114_s11, %s114_s11 }
  0x6b   :  { %p4352_p7 = scmp.ne.s32.totalorder %s114_s11, %s4351_s9  ;;  %p4357_p9 = scmp.lt.s32.totalorder %s4351_s9, %s4351_s9 }
  0x6d   :  { %p4358_p10 = por %p4357_p9, %p4356_p8 }
  0x6f   :  { %p4359_p11 = pnand %p4358_p10, %p4352_p7 }
  0x71   :  { %4362 = shalt.err (!%p4359_p11)
}
  0x72   :  { %119 = dma.hbm_to_vmem [thread:$0]  %s5099_s17, 2048, %s114_s11, [#allocation8], %s4371_s6, %s4371_s6, %s4372_s1  }
  0x73   :  { %4363 = dma.done.wait [#allocation3], 1024  }
  0x74   :  { %4364 = vsyncadd [#allocation3], 4294966272 }
  0x75   :  { %4365 = dma.done.wait [#allocation5], 2048  }
  0x76   :  { %4366 = vsyncadd [#allocation5], 4294965248 }
  0x77   :  { %4367 = dma.done.wait [#allocation8], 3072  }
  0x78   :  { %4368 = vsyncadd [#allocation8], 4294964224  ;;  %v4376_v0 = vmov 0   ;;  %s5132_s7 = sld [smem:[#allocation13_spill]]  ;;  %s5133_s28 = sld [smem:[#allocation14_spill]]  ;;  %v167_v3 = vld [vmem:[#allocation2] sm:$0xff]  ;;  %v153_v22 = vlaneseq }
  0x79   :  { %4173 = vset.pattern.permute.xlu0 %v4376_v0  ;;  %4174 = vset.pattern.permute.xlu1 %v4376_v0  ;;  %v168_v4 = vld [vmem:[#allocation2 + $0x8] sm:$0xff]  ;;  %v169_v5 = vld [vmem:[#allocation2 + $0x10] sm:$0xff]  ;;  %v170_v9 = vld [vmem:[#allocation2 + $0x18] sm:$0xff]  ;;  %v4377_v10 = vmov 0.0   ;;  %vm219_vm4 = vcmask 523264   ;;  %s5134_s27 = sld [smem:[#allocation19_spill]] }
  0x7a   :  { %v4619_v8 = vpack.c.bf16 %v168_v4, %v167_v3  ;;  %3787 = vmatprep.subr.mxu0 %v4377_v10  ;;  %v4622_v11 = vpack.c.bf16 %v170_v9, %v169_v5  ;;  %v171_v12 = vld [vmem:[#allocation2 + $0x20] sm:$0xff]  ;;  %v172_v13 = vld [vmem:[#allocation2 + $0x28] sm:$0xff]  ;;  %v173_v16 = vld [vmem:[#allocation2 + $0x30] sm:$0xff]  ;;  %v4639_v23 = vand.u32 127, %v153_v22  ;;  %v4647_v29 = vshrl.u32 %v153_v22, 7  ;;  %s5135_s0 = sld [smem:[#allocation20_spill]] }
  0x7b   :  { %v4627_v15 = vpack.c.bf16 %v172_v13, %v171_v12  ;;  %v174_v17 = vld [vmem:[#allocation2 + $0x38] sm:$0xff]  ;;  %v175_v39 = vld [vmem:[#allocation4] sm:$0xff]  ;;  %vm305_vm11 = vcmask 261120   ;;  %s5136_s25 = sld [smem:[#allocation21_spill]]  ;;  %vm4378_vm12 = vmmov 0   ;;  %s4379_s30 = smov 80  }
  0x7c   :  { %4015 = vmatprep.subr.bf16.mxu1 %v4619_v8  ;;  %v4631_v18 = vpack.c.bf16 %v174_v17, %v173_v16  ;;  %v195_v31 = vsub.s32 1, %v4647_v29  ;;  %v199_v32 = vsub.s32 2, %v4647_v29  ;;  %v215_v34 = vsub.s32 0, %v4647_v29  ;;  %v352_v63 = vld [vmem:[#allocation6] sm:$0xff]  ;;  %v355_v3 = vld [vmem:[#allocation6 + $0x18] sm:$0xff]  ;;  %3789 = vmatprep.mubr.msk.f32.mxu0 %vm4378_vm12, %v4377_v10  ;;  %s4380_s10 = smov 96  }
  0x7d   :  { %4017 = vmatpush3.bf16.msra.mxu1 %v4619_v8  ;;  %vm452_vm13 = vcmask 130048   ;;  %s5138_s1 = sld [smem:[#allocation15_spill]]  ;;  %vm533_vm15 = vcmask 64512   ;;  %s4383_s11 = smov 48   ;;  %v4768_v29 = vld [vmem:[%s5094_s12] ss:$0 sm:$0xff] }
  0x7e   :  { %v151_v1 = vld [vmem:[%s5132_s7] sm:$0xff]  ;;  %v152_v6 = vld [vmem:[%s5132_s7 + $0x8] sm:$0xff]  ;;  %4019 = vmatprep.subr.bf16.mxu1 %v4622_v11  ;;  %s5137_s7 = sld [smem:[#allocation23_spill]]  ;;  %s4384_s3 = smov 64  }
  0x7f   :  { %v176_v2 = vld [vmem:[%s5133_s28] sm:$0xff]  ;;  %156 = vperm.xlu0 %4173, %v151_v1   ;;  %v177_v19 = vld [vmem:[%s5133_s28 + $0x8] sm:$0xff]  ;;  %s4381_s28 = smov 112   ;;  %s5139_s6 = sld [smem:[#allocation24_spill]] }
  0x80   :  { %vm181_vm0 = vcmp.eq.s32.totalorder %v176_v2, 1  ;;  %vm179_vm1 = vcmp.eq.s32.totalorder %v176_v2, 0  ;;  %vm182_vm2 = vcmp.eq.s32.totalorder %v177_v19, 1  ;;  %vm180_vm3 = vcmp.eq.s32.totalorder %v177_v19, 0  ;;  %v178_v33 = vld [vmem:[%s5134_s27] sm:$0x7] }
  0x81   :  { %v183_v7 = vsel %vm181_vm0, 1, %v4376_v0  ;;  %v203_v14 = vsel %vm179_vm1, 1, %v4376_v0  ;;  %4021 = vmatpush3.bf16.msra.mxu1 %v4622_v11  ;;  %v184_v20 = vsel %vm182_vm2, 1, %v4376_v0  ;;  %v204_v21 = vsel %vm180_vm3, 1, %v4376_v0  ;;  %v353_v0 = vld [vmem:[#allocation6 + $0x8] sm:$0xff]  ;;  %v354_v2 = vld [vmem:[#allocation6 + $0x10] sm:$0xff]  ;;  %vm4127_vm0 = vmpackc.low %vm305_vm11, %vm305_vm11 }
  0x82   :  { %186 = vperm.xlu1 %4174, %v183_v7   ;;  %4023 = vmatprep.subr.bf16.mxu1 %v4627_v15  ;;  %v196_v35 = vrot.slane %v178_v33, %v195_v31  ;;  %v200_v36 = vrot.slane %v178_v33, %v199_v32  ;;  %v216_v40 = vrot.slane %v178_v33, %v215_v34  ;;  %v3525_v16 = vld [vmem:[%s5135_s0] ss:$0 sm:$0xff] }
  0x83   :  { %159 = vperm.xlu0 %4173, %v152_v6   ;;  %v4030_v1 = vpack.c.bf16 %v353_v0, %v352_v63  ;;  %v4034_v4 = vpack.c.bf16 %v355_v3, %v354_v2  ;;  %v3526_v19 = vld [vmem:[%s5136_s25] ss:$0 sm:$0xff]  ;;  %v4385_v63 = vmov 0.0|0.0  }
  0x85   :  { %4025 = vmatpush3.bf16.msra.mxu1 %v4627_v15 }
  0x86   :  { %189 = vperm.xlu1 %4174, %v184_v20   ;;  %4027 = vmatprep.subr.bf16.mxu1 %v4631_v18 }
  0x87   :  { %206 = vperm.xlu0 %4173, %v203_v14  }
  0x89   :  { %4029 = vmatpush3.bf16.msra.mxu1 %v4631_v18 }
  0x8a   :  { %209 = vperm.xlu1 %4174, %v204_v21   ;;  %4031 = vmatprep.subr.bf16.mxu1 %v4030_v1 }
  0xfe   :  { %v157_v24 = vpop.permute.xlu0 %156 }
  0xff   :  { %vm161_vm5 = vcmp.eq.s32.totalorder %v4639_v23, %v157_v24 }
 0x100   :  { %v3521_v25 = vsel %vm161_vm5, 1.0, %v4377_v10 }
 0x101   :  { %3763 = vmatprep.mubr.msk.f32.mxu1 %vm219_vm4, %v3521_v25  ;;  %v187_v28 = vpop.permute.xlu1 %186 }
 0x102   :  { %v160_v26 = vpop.permute.xlu0 %159  ;;  %vm191_vm8 = vcmp.eq.s32.totalorder %v187_v28, 1 }
 0x103   :  { %vm162_vm6 = vcmp.eq.s32.totalorder %v4639_v23, %v160_v26  ;;  %v201_v42 = vsel %vm191_vm8, %v196_v35, %v200_v36 }
 0x104   :  { %v3522_v27 = vsel %vm162_vm6, 1.0, %v4377_v10 }
 0x105   :  { %3764 = vmatmul.mubr.msk.f32.vlgmr.msra.gmra.mrb[0].mxu1 %vm219_vm4, %v3522_v27  ;;  %v190_v30 = vpop.permute.xlu1 %189  ;;  %v3527_v27 = vld [vmem:[%s5137_s7] ss:$0 sm:$0xff] }
 0x106   :  { %vm192_vm7 = vcmp.eq.s32.totalorder %v190_v30, 1  ;;  %v207_v38 = vpop.permute.xlu0 %206  ;;  %4033 = vmatpush3.bf16.msra.mxu1 %v4030_v1 }
 0x107   :  { %v202_v41 = vsel %vm192_vm7, %v196_v35, %v200_v36  ;;  %vm211_vm10 = vcmp.eq.s32.totalorder %v207_v38, 1  ;;  %4035 = vmatprep.subr.bf16.mxu1 %v4034_v4  ;;  %v349_v38 = vld [vmem:[%s5138_s1] sm:$0x3]  ;;  %s5140_s1 = sld [smem:[#allocation16_spill]] }
 0x108   :  { %v217_v48 = vsel %vm211_vm10, %v216_v40, %v201_v42  ;;  %vm350_vm14 = vcmp.gt.s32.totalorder %v349_v38, 0  ;;  %vm3418_vm10 = vcmask 7168  }
 0x109   :  { %v210_v37 = vpop.permute.xlu1 %209 }
 0x10a   :  { %vm212_vm9 = vcmp.eq.s32.totalorder %v210_v37, 1  ;;  %4037 = vmatpush3.bf16.msra.mxu1 %v4034_v4 }
 0x10b   :  { %v218_v46 = vsel %vm212_vm9, %v216_v40, %v202_v41  ;;  %3777 = vmatprep.subr.mxu1 %v4377_v10 }
 0x1d8   :  { %v3765_v43 = vpop.f32.mrb[0].mxu1 }
 0x1d9   :  { %v298_v44 = vadd.f32 %v3765_v43, %v175_v39  ;;  %v292_v45 = vpop.f32.mrb[1].mxu1 }
 0x1da   :  { %v293_v47 = vadd.f32 %v292_v45, %v175_v39  ;;  %v4382_v39 = vmov -10000.0  }
 0x1db   :  { %v302_v49 = vadd.f32 %v298_v44, %v218_v46  ;;  %v4702_v40 = vsel %vm350_vm14, 0.0, %v4382_v39  ;;  %vm3510_vm14 = vcmp.eq.s32.totalorder %v4639_v23, 2 }
 0x1dc   :  { %v301_v50 = vadd.f32 %v293_v47, %v217_v48  ;;  %v4707_v41 = vrot.slane %v4702_v40, %v215_v34 }
 0x1dd   :  { %v309_v51 = vsel %vm305_vm11, %v302_v49, 0.0 }
 0x1de   :  { %310 = vadd.xlane.f32.xlu1 %v309_v51  ;;  %v306_v52 = vsel %vm305_vm11, %v301_v50, 0.0 }
 0x1df   :  { %307 = vadd.xlane.f32.xlu0 %v306_v52 }
 0x26b   :  { %v311_v53 = vpop.xlane.xlu1 %310 }
 0x26c   :  { %v314_v54 = vmul.f32 0.03125, %v311_v53  ;;  %v308_v55 = vpop.xlane.xlu0 %307 }
 0x26d   :  { %v313_v56 = vmul.f32 0.03125, %v308_v55 }
 0x26e   :  { %v316_v57 = vsub.f32 %v302_v49, %v314_v54 }
 0x26f   :  { %v315_v58 = vsub.f32 %v301_v50, %v313_v56 }
 0x270   :  { %v318_v61 = vmul.f32 %v316_v57, %v316_v57 }
 0x271   :  { %v317_v59 = vmul.f32 %v315_v58, %v315_v58 }
 0x272   :  { %v322_v62 = vsel %vm305_vm11, %v318_v61, 0.0  ;;  %v446_v61 = vld [vmem:[#allocation7 + $0x10] sm:$0xff] }
 0x273   :  { %v319_v60 = vsel %vm305_vm11, %v317_v59, 0.0 }
 0x274   :  { %320 = vadd.xlane.f32.xlu0 %v319_v60 }
 0x278   :  { %323 = vadd.xlane.f32.xlu0 %v322_v62  ;;  %v447_v62 = vld [vmem:[#allocation7 + $0x18] sm:$0xff] }
 0x279   :  { %v4039_v0 = vpack.c.bf16 %v447_v62, %v446_v61 }
 0x301   :  { %v321_v5 = vpop.xlane.xlu0 %320 }
 0x302   :  { %v325_v6 = vmul.f32 0.03125, %v321_v5 }
 0x304   :  { %v327_v7 = vadd.f32 1e-06, %v325_v6  ;;  %v444_v6 = vld [vmem:[#allocation7] sm:$0xff] }
 0x305   :  { %v324_v9 = vpop.xlane.xlu0 %323 }
 0x306   :  { %4175 = vrsqrt.f32 %v327_v7  ;;  %v326_v12 = vmul.f32 0.03125, %v324_v9  ;;  %v445_v7 = vld [vmem:[#allocation7 + $0x8] sm:$0xff] }
 0x308   :  { %v328_v13 = vadd.f32 1e-06, %v326_v12 }
 0x30a   :  { %4177 = vrsqrt.f32 %v328_v13  ;;  %v4729_v13 = vpack.c.bf16 %v445_v7, %v444_v6 }
 0x310   :  { %v4176_v14 = vpop.eup %4175 }
 0x311   :  { %v331_v17 = vmul.f32 %v4176_v14, %v315_v58 }
 0x313   :  { %v339_v20 = vmul.f32 %v3525_v16, %v331_v17 }
 0x314   :  { %v4178_v21 = vpop.eup %4177 }
 0x315   :  { %v332_v22 = vmul.f32 %v4178_v21, %v316_v57  ;;  %v4670_v24 = vadd.f32 %v3526_v19, %v339_v20 }
 0x317   :  { %v340_v25 = vmul.f32 %v3525_v16, %v332_v22  ;;  %3774 = vmatprep.mubr.msk.f32.mxu1 %vm305_vm11, %v4670_v24 }
 0x319   :  { %v4674_v26 = vadd.f32 %v3526_v19, %v340_v25 }
 0x31b   :  { %3775 = vmatmul.mubr.msk.f32.vlgmr.msra.gmra.mrb[2].mxu1 %vm305_vm11, %v4674_v26 }
 0x31c   :  { %3779 = vmatprep.mubr.msk.f32.mxu1 %vm4378_vm12, %v4377_v10 }
 0x3ee   :  { %v3776_v28 = vpop.f32.mrb[2].mxu1 }
 0x3ef   :  { %v4685_v30 = vadd.f32 %v3776_v28, %v3527_v27  ;;  %v435_v32 = vpop.f32.mrb[3].mxu1 }
 0x3f0   :  { %v436_v33 = vadd.f32 %v3527_v27, %v435_v32 }
 0x3f2   :  { %623 = vrot.lane.b32.xlu0 %v436_v33, %s4379_s30  ;;  %450 = vrot.lane.b32.xlu1 %v436_v33, %s4380_s10 }
 0x3f6   :  { %621 = vrot.lane.b32.xlu1 %v436_v33, %s4381_s28 }
 0x464   :  { %v624_v35 = vpop.permute.xlu0 %623  ;;  %v451_v36 = vpop.permute.xlu1 %450 }
 0x465   :  { %3778 = vmatpush3.xpose.msk.msra.mxu1 %vm452_vm13, %v451_v36  ;;  %3788 = vmatpush3.xpose.msk.msra.mxu0 %vm452_vm13, %v624_v35  ;;  %v4757_v36 = vrot.slane %v4702_v40, %v195_v31 }
 0x466   :  { %3782 = vmatprep.subr.mxu1 %v4377_v10  ;;  %4038 = vmatprep.subr.bf16.mxu0 %v4385_v63 }
 0x468   :  { %3780 = vmatmul.mubr.msk.f32.vlgmr.msra.gmra.mrb[4].mxu1 %vm452_vm13, %v436_v33  ;;  %v622_v37 = vpop.permute.xlu1 %621 }
 0x469   :  { %3790 = vmatmul.mubr.msk.f32.vlgmr.msra.gmra.mrb[0].mxu0 %vm452_vm13, %v622_v37  ;;  %3784 = vmatprep.mubr.msk.f32.mxu1 %vm4378_vm12, %v4377_v10 }
 0x46a   :  { %3801 = vmatprep.mubr.msk.f32.mxu0 %vm4378_vm12, %v4377_v10  ;;  %4040 = vmatpush3.bf16.msra.mxu0 %v4039_v0 }
 0x46b   :  { %3811 = vmatprep.subr.mxu0 %v4377_v10 }
 0x53b   :  { %v523_v42 = vpop.f32.mrb[4].mxu1 }
 0x53c   :  { %v527_v43 = vmul.f32 0.25, %v523_v42  ;;  %v3781_v44 = vpop.f32.mrb[5].mxu1  ;;  %v695_v45 = vpop.f32.mrb[0].mxu0 }
 0x53d   :  { %v699_v46 = vmul.f32 0.25, %v695_v45  ;;  %v3791_v47 = vpop.f32.mrb[1].mxu0 }
 0x53e   :  { %v532_v48 = vadd.f32 %v4707_v41, %v527_v43 }
 0x53f   :  { %v700_v49 = vadd.f32 %v699_v46, %v4707_v41 }
 0x540   :  { %v534_v50 = vsel %vm533_vm15, %v532_v48, -inf }
 0x541   :  { %535 = vmax.xlane.f32.xlu1 %v534_v50  ;;  %v701_v51 = vsel %vm533_vm15, %v700_v49, -inf }
 0x542   :  { %702 = vmax.xlane.f32.xlu0 %v701_v51 }
 0x5ce   :  { %v536_v52 = vpop.xlane.xlu1 %535 }
 0x5cf   :  { %v537_v34 = vsub.f32 %v532_v48, %v536_v52  ;;  %v703_v53 = vpop.xlane.xlu0 %702 }
 0x5d0   :  { %v704_v54 = vsub.f32 %v700_v49, %v703_v53 }
 0x5d1   :  { %v538_v55 = vmul.f32 1.442695, %v537_v34 }
 0x5d2   :  { %v705_v56 = vmul.f32 1.442695, %v704_v54 }
 0x5d3   :  { %4179 = vpow2.f32 %v538_v55 }
 0x5d4   :  { %4181 = vpow2.f32 %v705_v56 }
 0x5dd   :  { %v4180_v57 = vpop.eup %4179 }
 0x5de   :  { %v4182_v58 = vpop.eup %4181  ;;  %v540_v59 = vsel %vm533_vm15, %v4180_v57, 0.0 }
 0x5df   :  { %541 = vadd.xlane.f32.xlu0 %v540_v59  ;;  %v707_v60 = vsel %vm533_vm15, %v4182_v58, 0.0 }
 0x5e0   :  { %708 = vadd.xlane.f32.xlu1 %v707_v60 }
 0x5f1   :  { %712 = vrot.lane.b32.xlu1 %v436_v33, %s4383_s11 }
 0x5f5   :  { %942 = vrot.lane.b32.xlu1 %v4685_v30, %s4380_s10  ;;  %545 = vrot.lane.b32.xlu0 %v436_v33, %s4384_s3 }
 0x5f9   :  { %1111 = vrot.lane.b32.xlu1 %v4685_v30, %s4381_s28  ;;  %1113 = vrot.lane.b32.xlu0 %v4685_v30, %s4379_s30 }
 0x66c   :  { %v542_v1 = vpop.xlane.xlu0 %541 }
 0x66d   :  { %4183 = vrcp.f32 %v542_v1  ;;  %v709_v2 = vpop.xlane.xlu1 %708 }
 0x66e   :  { %4185 = vrcp.f32 %v709_v2 }
 0x670   :  { %v546_v3 = vpop.permute.xlu0 %545 }
 0x671   :  { %3783 = vmatpush3.msra.mxu1 %v546_v3  ;;  %v713_v12 = vpop.permute.xlu1 %712 }
 0x672   :  { %3792 = vmatprep.subr.mxu1 %v4377_v10 }
 0x674   :  { %v1114_v22 = vpop.permute.xlu0 %1113 }
 0x675   :  { %v943_v20 = vpop.permute.xlu1 %942 }
 0x677   :  { %v4184_v4 = vpop.eup %4183 }
 0x678   :  { %v544_v5 = vmul.f32 %v4184_v4, %v4180_v57  ;;  %v4186_v9 = vpop.eup %4185 }
 0x679   :  { %v711_v14 = vmul.f32 %v4186_v9, %v4182_v58  ;;  %v1112_v25 = vpop.permute.xlu1 %1111 }
 0x67a   :  { %3785 = vmatmul.mubr.msk.f32.vlgmr.msra.gmra.mrb[6].mxu1 %vm533_vm15, %v544_v5 }
 0x67b   :  { %3793 = vmatpush3.msra.mxu1 %v713_v12  ;;  %3794 = vmatprep.mubr.msk.f32.mxu1 %vm4378_vm12, %v4377_v10 }
 0x67c   :  { %4041 = vmatprep.subr.bf16.mxu1 %v4385_v63 }
 0x67e   :  { %3795 = vmatmul.mubr.msk.f32.vlgmr.msra.gmra.mrb[8].mxu1 %vm533_vm15, %v711_v14 }
 0x67f   :  { %4043 = vmatpush3.bf16.msra.mxu1 %v4729_v13  ;;  %3808 = vmatprep.mubr.msk.f32.mxu1 %vm4378_vm12, %v4377_v10 }
 0x680   :  { %3816 = vmatprep.subr.mxu1 %v4377_v10 }
 0x74d   :  { %v617_v16 = vpop.f32.mrb[6].mxu1 }
 0x74e   :  { %v3786_v17 = vpop.f32.mrb[7].mxu1  ;;  %3809 = vmatmul.mubr.msk.f32.vlgmr.msra.gmra.mrb[10].mxu1 %vm452_vm13, %v617_v16 }
 0x74f   :  { %3818 = vmatprep.mubr.msk.f32.mxu1 %vm4378_vm12, %v4377_v10  ;;  %v3547_v17 = vld [vmem:[%s5095_s13] ss:$0 sm:$0xff] }
 0x751   :  { %v784_v19 = vpop.f32.mrb[8].mxu1 }
 0x752   :  { %v3796_v21 = vpop.f32.mrb[9].mxu1  ;;  %3802 = vmatmul.mubr.msk.f32.vlgmr.msra.gmra.mrb[2].mxu0 %vm452_vm13, %v784_v19 }
 0x753   :  { %3812 = vmatpush3.xpose.msk.msra.mxu0 %vm452_vm13, %v943_v20  ;;  %3813 = vmatprep.mubr.msk.f32.mxu0 %vm4378_vm12, %v4377_v10 }
 0x754   :  { %3821 = vmatprep.subr.mxu0 %v4377_v10 }
 0x756   :  { %3814 = vmatmul.mubr.msk.f32.vlgmr.msra.gmra.mrb[4].mxu0 %vm452_vm13, %v4685_v30 }
 0x757   :  { %3822 = vmatpush3.xpose.msk.msra.mxu0 %vm452_vm13, %v1114_v22  ;;  %3823 = vmatprep.mubr.msk.f32.mxu0 %vm4378_vm12, %v4377_v10 }
 0x758   :  { %4044 = vmatprep.subr.bf16.mxu0 %v4385_v63 }
 0x75a   :  { %3824 = vmatmul.mubr.msk.f32.vlgmr.msra.gmra.mrb[6].mxu0 %vm452_vm13, %v1112_v25 }
 0x75b   :  { %4046 = vmatpush3.bf16.msra.mxu0 %v4039_v0  ;;  %3835 = vmatprep.mubr.msk.f32.mxu0 %vm4378_vm12, %v4377_v10 }
 0x821   :  { %v930_v27 = vpop.f32.mrb[10].mxu1 }
 0x822   :  { %v3810_v28 = vpop.f32.mrb[11].mxu1 }
 0x825   :  { %v857_v32 = vpop.f32.mrb[2].mxu0 }
 0x826   :  { %v931_v33 = vadd.f32 %v930_v27, %v857_v32  ;;  %v3803_v35 = vpop.f32.mrb[3].mxu0 }
 0x828   :  { %v940_v31 = vadd.f32 %v4768_v29, %v931_v33 }
 0x829   :  { %v1014_v37 = vpop.f32.mrb[4].mxu0 }
 0x82a   :  { %v1018_v38 = vmul.f32 0.25, %v1014_v37  ;;  %v3815_v39 = vpop.f32.mrb[5].mxu0  ;;  %v1425_v40 = vadd.f32 %v940_v31, %v4670_v24 }
 0x82c   :  { %v1023_v42 = vadd.f32 %v4757_v36, %v1018_v38  ;;  %v1429_v49 = vsel %vm305_vm11, %v1425_v40, 0.0 }
 0x82d   :  { %v1185_v43 = vpop.f32.mrb[6].mxu0 }
 0x82e   :  { %v1189_v44 = vmul.f32 0.25, %v1185_v43  ;;  %v3825_v45 = vpop.f32.mrb[7].mxu0  ;;  %v1024_v46 = vsel %vm533_vm15, %v1023_v42, -inf }
 0x82f   :  { %1025 = vmax.xlane.f32.xlu0 %v1024_v46 }
 0x830   :  { %v1190_v47 = vadd.f32 %v1189_v44, %v4757_v36 }
 0x832   :  { %v1191_v48 = vsel %vm533_vm15, %v1190_v47, -inf }
 0x833   :  { %1192 = vmax.xlane.f32.xlu1 %v1191_v48  ;;  %v1471_v48 = vld [vmem:[%s5097_s15] sm:$0xff] }
 0x844   :  { %1035 = vrot.lane.b32.xlu1 %v4685_v30, %s4384_s3 }
 0x868   :  { %1430 = vadd.xlane.f32.xlu1 %v1429_v49 }
 0x8bc   :  { %v1026_v50 = vpop.xlane.xlu0 %1025 }
 0x8bd   :  { %v1027_v51 = vsub.f32 %v1023_v42, %v1026_v50 }
 0x8bf   :  { %v1028_v52 = vmul.f32 1.442695, %v1027_v51 }
 0x8c0   :  { %v1193_v34 = vpop.xlane.xlu1 %1192 }
 0x8c1   :  { %4187 = vpow2.f32 %v1028_v52  ;;  %v1194_v53 = vsub.f32 %v1190_v47, %v1193_v34 }
 0x8c3   :  { %v1195_v54 = vmul.f32 1.442695, %v1194_v53 }
 0x8c4   :  { %v1036_v55 = vpop.permute.xlu1 %1035 }
 0x8c5   :  { %4189 = vpow2.f32 %v1195_v54  ;;  %3817 = vmatpush3.msra.mxu1 %v1036_v55 }
 0x8c6   :  { %3826 = vmatprep.subr.mxu1 %v4377_v10 }
 0x8cb   :  { %v4188_v56 = vpop.eup %4187 }
 0x8cc   :  { %v1030_v57 = vsel %vm533_vm15, %v4188_v56, 0.0 }
 0x8cd   :  { %1031 = vadd.xlane.f32.xlu0 %v1030_v57  ;;  %v1582_v57 = vld [vmem:[#allocation9 + $0x8] sm:$0xff] }
 0x8cf   :  { %v4190_v24 = vpop.eup %4189 }
 0x8d0   :  { %v1197_v58 = vsel %vm533_vm15, %v4190_v24, 0.0 }
 0x8d1   :  { %1198 = vadd.xlane.f32.xlu0 %v1197_v58  ;;  %v1583_v58 = vld [vmem:[#allocation9 + $0x10] sm:$0xff] }
 0x8e7   :  { %1202 = vrot.lane.b32.xlu0 %v4685_v30, %s4383_s11 }
 0x8f5   :  { %v1431_v59 = vpop.xlane.xlu1 %1430 }
 0x8f6   :  { %v1435_v60 = vmul.f32 0.03125, %v1431_v59  ;;  %v1584_v59 = vld [vmem:[#allocation9 + $0x18] sm:$0xff] }
 0x8f8   :  { %v1437_v61 = vsub.f32 %v1425_v40, %v1435_v60  ;;  %v1474_v40 = vld [vmem:[%s5097_s15 + $0x18] sm:$0xff]  ;;  %v4062_v60 = vpack.c.bf16 %v1584_v59, %v1583_v58  ;;  %v1727_v58 = vld [vmem:[#allocation6 + $0x38] sm:$0xff] }
 0x8fa   :  { %v1439_v62 = vmul.f32 %v1437_v61, %v1437_v61 }
 0x8fc   :  { %v1441_v0 = vsel %vm305_vm11, %v1439_v62, 0.0  ;;  %v1586_v62 = vld [vmem:[#allocation9 + $0x28] sm:$0xff] }
 0x8fd   :  { %1442 = vadd.xlane.f32.xlu1 %v1441_v0 }
 0x95a   :  { %v1032_v1 = vpop.xlane.xlu0 %1031 }
 0x95b   :  { %4191 = vrcp.f32 %v1032_v1  ;;  %v1587_v1 = vld [vmem:[#allocation9 + $0x30] sm:$0xff] }
 0x95e   :  { %v1199_v2 = vpop.xlane.xlu0 %1198 }
 0x95f   :  { %4193 = vrcp.f32 %v1199_v2  ;;  %v1588_v2 = vld [vmem:[#allocation9 + $0x38] sm:$0xff] }
 0x962   :  { %v1203_v5 = vpop.permute.xlu0 %1202 }
 0x965   :  { %v4192_v3 = vpop.eup %4191 }
 0x966   :  { %v1034_v4 = vmul.f32 %v4192_v3, %v4188_v56  ;;  %v1581_v56 = vld [vmem:[#allocation9] sm:$0xff]  ;;  %v4070_v3 = vpack.c.bf16 %v1588_v2, %v1587_v1 }
 0x968   :  { %3819 = vmatmul.mubr.msk.f32.vlgmr.msra.gmra.mrb[12].mxu1 %vm533_vm15, %v1034_v4  ;;  %v3549_v4 = vld [vmem:[%s5098_s16] ss:$0 sm:$0xff] }
 0x969   :  { %v4194_v6 = vpop.eup %4193  ;;  %3827 = vmatpush3.msra.mxu1 %v1203_v5  ;;  %3828 = vmatprep.mubr.msk.f32.mxu1 %vm4378_vm12, %v4377_v10 }
 0x96a   :  { %v1201_v30 = vmul.f32 %v4194_v6, %v4190_v24  ;;  %4047 = vmatprep.subr.bf16.mxu1 %v4385_v63  ;;  %v4058_v24 = vpack.c.bf16 %v1582_v57, %v1581_v56  ;;  %v1725_v56 = vld [vmem:[#allocation6 + $0x28] sm:$0xff] }
 0x96c   :  { %3829 = vmatmul.mubr.msk.f32.vlgmr.msra.gmra.mrb[14].mxu1 %vm533_vm15, %v1201_v30 }
 0x96d   :  { %4049 = vmatpush3.bf16.msra.mxu1 %v4729_v13  ;;  %3842 = vmatprep.mubr.msk.f32.mxu1 %vm4378_vm12, %v4377_v10  ;;  %v3548_v13 = vld [vmem:[%s5096_s14] ss:$0 sm:$0xff] }
 0x96e   :  { %4059 = vmatprep.subr.bf16.mxu1 %v4058_v24 }
 0x98a   :  { %v1443_v7 = vpop.xlane.xlu1 %1442 }
 0x98b   :  { %v1447_v9 = vmul.f32 0.03125, %v1443_v7 }
 0x98d   :  { %v1449_v12 = vadd.f32 1e-06, %v1447_v9 }
 0x98f   :  { %4195 = vrsqrt.f32 %v1449_v12 }
 0x999   :  { %v4196_v14 = vpop.eup %4195 }
 0x99a   :  { %v1453_v16 = vmul.f32 %v4196_v14, %v1437_v61  ;;  %v1585_v61 = vld [vmem:[#allocation9 + $0x20] sm:$0xff] }
 0x99b   :  { %v4066_v0 = vpack.c.bf16 %v1586_v62, %v1585_v61 }
 0x99c   :  { %v1461_v20 = vmul.f32 %v3547_v17, %v1453_v16 }
 0x99e   :  { %v4794_v25 = vadd.f32 %v3548_v13, %v1461_v20 }
 0xa3b   :  { %v1107_v19 = vpop.f32.mrb[12].mxu1 }
 0xa3c   :  { %v3820_v21 = vpop.f32.mrb[13].mxu1  ;;  %3843 = vmatmul.mubr.msk.f32.vlgmr.msra.gmra.mrb[16].mxu1 %vm452_vm13, %v1107_v19 }
 0xa3d   :  { %4061 = vmatpush3.bf16.msra.mxu1 %v4058_v24  ;;  %v1726_v24 = vld [vmem:[#allocation6 + $0x30] sm:$0xff] }
 0xa3e   :  { %4063 = vmatprep.subr.bf16.mxu1 %v4062_v60  ;;  %v4078_v59 = vpack.c.bf16 %v1727_v58, %v1726_v24  ;;  %v1819_v24 = vld [vmem:[#allocation7 + $0x28] sm:$0xff] }
 0xa3f   :  { %v1274_v22 = vpop.f32.mrb[14].mxu1 }
 0xa40   :  { %v3830_v27 = vpop.f32.mrb[15].mxu1  ;;  %3836 = vmatmul.mubr.msk.f32.vlgmr.msra.gmra.mrb[8].mxu0 %vm452_vm13, %v1274_v22 }
 0xa41   :  { %3853 = vmatprep.mubr.msk.f32.mxu0 %vm305_vm11, %v4794_v25  ;;  %4065 = vmatpush3.bf16.msra.mxu1 %v4062_v60 }
 0xa42   :  { %4067 = vmatprep.subr.bf16.mxu1 %v4066_v0 }
 0xa45   :  { %4069 = vmatpush3.bf16.msra.mxu1 %v4066_v0 }
 0xa46   :  { %4071 = vmatprep.subr.bf16.mxu1 %v4070_v3 }
 0xa49   :  { %4073 = vmatpush3.bf16.msra.mxu1 %v4070_v3 }
 0xa4a   :  { %3891 = vmatprep.subr.mxu1 %v4377_v10 }
 0xb0f   :  { %v1420_v28 = vpop.f32.mrb[16].mxu1 }
 0xb10   :  { %v3844_v32 = vpop.f32.mrb[17].mxu1 }
 0xb13   :  { %v1347_v33 = vpop.f32.mrb[8].mxu0 }
 0xb14   :  { %v1421_v35 = vadd.f32 %v1420_v28, %v1347_v33  ;;  %v3837_v37 = vpop.f32.mrb[9].mxu0 }
 0xb16   :  { %v1424_v38 = vadd.f32 %v4768_v29, %v1421_v35  ;;  %v1472_v29 = vld [vmem:[%s5097_s15 + $0x8] sm:$0xff] }
 0xb17   :  { %v4050_v31 = vpack.c.bf16 %v1472_v29, %v1471_v48 }
 0xb18   :  { %v1426_v39 = vadd.f32 %v1424_v38, %v4674_v26  ;;  %v1473_v26 = vld [vmem:[%s5097_s15 + $0x10] sm:$0xff] }
 0xb19   :  { %4051 = vmatprep.subr.bf16.mxu0 %v4050_v31  ;;  %v4054_v49 = vpack.c.bf16 %v1474_v40, %v1473_v26 }
 0xb1a   :  { %v1432_v42 = vsel %vm305_vm11, %v1426_v39, 0.0  ;;  %4053 = vmatpush3.bf16.msra.mxu0 %v4050_v31 }
 0xb1b   :  { %1433 = vadd.xlane.f32.xlu0 %v1432_v42  ;;  %4055 = vmatprep.subr.bf16.mxu0 %v4054_v49  ;;  %v3552_v42 = vld [vmem:[%s5100_s18] ss:$0 sm:$0xff] }
 0xb1e   :  { %4057 = vmatpush3.bf16.msra.mxu0 %v4054_v49 }
 0xba8   :  { %v1434_v43 = vpop.xlane.xlu0 %1433 }
 0xba9   :  { %v1436_v44 = vmul.f32 0.03125, %v1434_v43 }
 0xbab   :  { %v1438_v45 = vsub.f32 %v1426_v39, %v1436_v44 }
 0xbad   :  { %v1440_v46 = vmul.f32 %v1438_v45, %v1438_v45 }
 0xbaf   :  { %v1444_v47 = vsel %vm305_vm11, %v1440_v46, 0.0 }
 0xbb0   :  { %1445 = vadd.xlane.f32.xlu0 %v1444_v47 }
 0xc3d   :  { %v1446_v50 = vpop.xlane.xlu0 %1445 }
 0xc3e   :  { %v1448_v51 = vmul.f32 0.03125, %v1446_v50 }
 0xc40   :  { %v1450_v52 = vadd.f32 1e-06, %v1448_v51 }
 0xc42   :  { %4197 = vrsqrt.f32 %v1450_v52 }
 0xc4c   :  { %v4198_v34 = vpop.eup %4197 }
 0xc4d   :  { %v1454_v53 = vmul.f32 %v4198_v34, %v1438_v45 }
 0xc4f   :  { %v1462_v54 = vmul.f32 %v3547_v17, %v1454_v53 }
 0xc51   :  { %v1470_v55 = vadd.f32 %v3548_v13, %v1462_v54 }
 0xc53   :  { %3854 = vmatmul.mubr.msk.f32.vlgmr.msra.gmra.mrb[10].mxu0 %vm305_vm11, %v1470_v55 }
 0xd26   :  { %v3855_v5 = vpop.f32.mrb[10].mxu0 }
 0xd27   :  { %v1560_v6 = vadd.f32 %v3855_v5, %v3549_v4  ;;  %v1554_v30 = vpop.f32.mrb[11].mxu0 }
 0xd28   :  { %v1555_v7 = vadd.f32 %v3549_v4, %v1554_v30  ;;  %v3555_v4 = vld [vmem:[%s5101_s19] ss:$0 sm:$0xff] }
 0xd29   :  { %v1564_v9 = vmul.f32 %v1560_v6, %v1560_v6 }
 0xd2a   :  { %v1563_v12 = vmul.f32 %v1555_v7, %v1555_v7 }
 0xd2b   :  { %v1566_v14 = vmul.f32 %v1564_v9, %v1560_v6 }
 0xd2c   :  { %v1565_v16 = vmul.f32 %v1563_v12, %v1555_v7 }
 0xd2d   :  { %v1568_v17 = vmul.f32 0.044715, %v1566_v14 }
 0xd2e   :  { %v1567_v19 = vmul.f32 0.044715, %v1565_v16 }
 0xd2f   :  { %v1570_v20 = vadd.f32 %v1568_v17, %v1560_v6  ;;  %v3558_v17 = vld [vmem:[%s5137_s7 + $0x1] ss:$0 sm:$0xff] }
 0xd30   :  { %v1569_v21 = vadd.f32 %v1567_v19, %v1555_v7 }
 0xd31   :  { %v1572_v13 = vmul.f32 0.7978846, %v1570_v20 }
 0xd32   :  { %v1571_v22 = vmul.f32 0.7978846, %v1569_v21 }
 0xd33   :  { %4199 = vtanh.f32 %v1572_v13 }
 0xd34   :  { %4201 = vtanh.f32 %v1571_v22 }
 0xd3d   :  { %v4200_v27 = vpop.eup %4199 }
 0xd3e   :  { %v4202_v28 = vpop.eup %4201  ;;  %v1576_v32 = vadd.f32 1.0, %v4200_v27 }
 0xd3f   :  { %v1575_v33 = vadd.f32 1.0, %v4202_v28 }
 0xd40   :  { %v1578_v35 = vmul.f32 0.5, %v1576_v32 }
 0xd41   :  { %v1577_v37 = vmul.f32 0.5, %v1575_v33 }
 0xd42   :  { %v1580_v39 = vmul.f32 %v1578_v35, %v1560_v6 }
 0xd43   :  { %v1579_v38 = vmul.f32 %v1577_v37, %v1555_v7  ;;  %v3556_v7 = vld [vmem:[%s5102_s20] ss:$0 sm:$0xff] }
 0xd45   :  { %3872 = vmatprep.mubr.msk.f32.mxu1 %vm219_vm4, %v1579_v38 }
 0xd46   :  { %3873 = vmatmul.mubr.msk.f32.vlgmr.msra.gmra.mrb[18].mxu1 %vm219_vm4, %v1580_v39 }
 0xd47   :  { %3893 = vmatprep.mubr.msk.f32.mxu1 %vm4378_vm12, %v4377_v10 }
 0xe19   :  { %v3874_v43 = vpop.f32.mrb[18].mxu1 }
 0xe1a   :  { %v1674_v44 = vadd.f32 %v3874_v43, %v3552_v42  ;;  %v1668_v45 = vpop.f32.mrb[19].mxu1 }
 0xe1b   :  { %v1669_v46 = vadd.f32 %v3552_v42, %v1668_v45 }
 0xe1c   :  { %v1678_v47 = vadd.f32 %v1674_v44, %v1470_v55 }
 0xe1d   :  { %v1677_v48 = vadd.f32 %v1669_v46, %v4794_v25  ;;  %v1724_v25 = vld [vmem:[#allocation6 + $0x20] sm:$0xff] }
 0xe1e   :  { %v1684_v29 = vsel %vm305_vm11, %v1678_v47, 0.0  ;;  %v4074_v57 = vpack.c.bf16 %v1725_v56, %v1724_v25 }
 0xe1f   :  { %1685 = vadd.xlane.f32.xlu0 %v1684_v29  ;;  %v1681_v31 = vsel %vm305_vm11, %v1677_v48, 0.0 }
 0xe20   :  { %1682 = vadd.xlane.f32.xlu1 %v1681_v31  ;;  %4075 = vmatprep.subr.bf16.mxu0 %v4074_v57 }
 0xe21   :  { %4077 = vmatpush3.bf16.msra.mxu0 %v4074_v57  ;;  %v1818_v57 = vld [vmem:[#allocation7 + $0x20] sm:$0xff] }
 0xe22   :  { %4079 = vmatprep.subr.bf16.mxu0 %v4078_v59 }
 0xe25   :  { %4081 = vmatpush3.bf16.msra.mxu0 %v4078_v59 }
 0xe26   :  { %3886 = vmatprep.subr.mxu0 %v4377_v10 }
 0xeac   :  { %v1686_v26 = vpop.xlane.xlu0 %1685 }
 0xead   :  { %v1688_v40 = vmul.f32 0.03125, %v1686_v26  ;;  %v1683_v49 = vpop.xlane.xlu1 %1682 }
 0xeae   :  { %v1687_v50 = vmul.f32 0.03125, %v1683_v49 }
 0xeaf   :  { %v1690_v51 = vsub.f32 %v1678_v47, %v1688_v40 }
 0xeb0   :  { %v1689_v52 = vsub.f32 %v1677_v48, %v1687_v50 }
 0xeb1   :  { %v1692_v34 = vmul.f32 %v1690_v51, %v1690_v51 }
 0xeb2   :  { %v1691_v53 = vmul.f32 %v1689_v52, %v1689_v52 }
 0xeb3   :  { %v1696_v54 = vsel %vm305_vm11, %v1692_v34, 0.0 }
 0xeb4   :  { %1697 = vadd.xlane.f32.xlu0 %v1696_v54  ;;  %v1693_v55 = vsel %vm305_vm11, %v1691_v53, 0.0 }
 0xeb5   :  { %1694 = vadd.xlane.f32.xlu1 %v1693_v55 }
 0xf41   :  { %v1698_v60 = vpop.xlane.xlu0 %1697 }
 0xf42   :  { %v1700_v61 = vmul.f32 0.03125, %v1698_v60  ;;  %v1695_v62 = vpop.xlane.xlu1 %1694  ;;  %v4886_v60 = vpack.c.bf16 %v1819_v24, %v1818_v57 }
 0xf43   :  { %v1699_v0 = vmul.f32 0.03125, %v1695_v62 }
 0xf44   :  { %v1702_v1 = vadd.f32 1e-06, %v1700_v61 }
 0xf45   :  { %v1701_v2 = vadd.f32 1e-06, %v1699_v0 }
 0xf46   :  { %4203 = vrsqrt.f32 %v1702_v1 }
 0xf47   :  { %4205 = vrsqrt.f32 %v1701_v2 }
 0xf50   :  { %v4204_v3 = vpop.eup %4203 }
 0xf51   :  { %v4206_v5 = vpop.eup %4205  ;;  %v1706_v6 = vmul.f32 %v4204_v3, %v1690_v51 }
 0xf52   :  { %v1705_v30 = vmul.f32 %v4206_v5, %v1689_v52  ;;  %v1821_v52 = vld [vmem:[#allocation7 + $0x38] sm:$0xff] }
 0xf53   :  { %v1714_v9 = vmul.f32 %v3555_v4, %v1706_v6 }
 0xf54   :  { %v1713_v12 = vmul.f32 %v3555_v4, %v1705_v30 }
 0xf55   :  { %v4841_v16 = vadd.f32 %v3556_v7, %v1714_v9 }
 0xf56   :  { %v4839_v14 = vadd.f32 %v3556_v7, %v1713_v12 }
 0xf58   :  { %3883 = vmatprep.mubr.msk.f32.mxu0 %vm305_vm11, %v4839_v14 }
 0xf59   :  { %3884 = vmatmul.mubr.msk.f32.vlgmr.msra.gmra.mrb[12].mxu0 %vm305_vm11, %v4841_v16 }
 0xf5a   :  { %3888 = vmatprep.mubr.msk.f32.mxu0 %vm4378_vm12, %v4377_v10 }
0x102c   :  { %v3885_v19 = vpop.f32.mrb[12].mxu0 }
0x102d   :  { %v4852_v20 = vadd.f32 %v3885_v19, %v3558_v17  ;;  %v1808_v21 = vpop.f32.mrb[13].mxu0 }
0x102e   :  { %v1809_v13 = vadd.f32 %v3558_v17, %v1808_v21 }
0x1030   :  { %1992 = vrot.lane.b32.xlu0 %v1809_v13, %s4379_s30  ;;  %1825 = vrot.lane.b32.xlu1 %v1809_v13, %s4380_s10 }
0x1034   :  { %1990 = vrot.lane.b32.xlu1 %v1809_v13, %s4381_s28 }
0x10a2   :  { %v1826_v22 = vpop.permute.xlu1 %1825  ;;  %v1993_v27 = vpop.permute.xlu0 %1992 }
0x10a3   :  { %3887 = vmatpush3.xpose.msk.msra.mxu0 %vm452_vm13, %v1826_v22 }
0x10a4   :  { %3896 = vmatprep.subr.mxu0 %v4377_v10 }
0x10a6   :  { %3889 = vmatmul.mubr.msk.f32.vlgmr.msra.gmra.mrb[14].mxu0 %vm452_vm13, %v1809_v13  ;;  %v1991_v28 = vpop.permute.xlu1 %1990 }
0x10a7   :  { %3897 = vmatpush3.xpose.msk.msra.mxu0 %vm452_vm13, %v1993_v27  ;;  %3898 = vmatprep.mubr.msk.f32.mxu0 %vm4378_vm12, %v4377_v10 }
0x10a8   :  { %4082 = vmatprep.subr.bf16.mxu0 %v4385_v63 }
0x10aa   :  { %3899 = vmatmul.mubr.msk.f32.vlgmr.msra.gmra.mrb[16].mxu0 %vm452_vm13, %v1991_v28 }
0x10ab   :  { %3910 = vmatprep.mubr.msk.f32.mxu0 %vm4378_vm12, %v4377_v10 }
0x1179   :  { %v1897_v32 = vpop.f32.mrb[14].mxu0 }
0x117a   :  { %v1901_v33 = vmul.f32 0.25, %v1897_v32  ;;  %v3890_v35 = vpop.f32.mrb[15].mxu0 }
0x117c   :  { %v1902_v37 = vadd.f32 %v1901_v33, %v4707_v41 }
0x117d   :  { %v2064_v38 = vpop.f32.mrb[16].mxu0 }
0x117e   :  { %v2068_v39 = vmul.f32 0.25, %v2064_v38  ;;  %v3900_v42 = vpop.f32.mrb[17].mxu0  ;;  %v1903_v43 = vsel %vm533_vm15, %v1902_v37, -inf }
0x117f   :  { %1904 = vmax.xlane.f32.xlu1 %v1903_v43 }
0x1180   :  { %v2069_v44 = vadd.f32 %v2068_v39, %v4707_v41  ;;  %v1820_v41 = vld [vmem:[#allocation7 + $0x30] sm:$0xff] }
0x1181   :  { %v4083_v34 = vpack.c.bf16 %v1821_v52, %v1820_v41 }
0x1182   :  { %v2070_v45 = vsel %vm533_vm15, %v2069_v44, -inf }
0x1183   :  { %2071 = vmax.xlane.f32.xlu0 %v2070_v45  ;;  %4084 = vmatpush3.bf16.msra.mxu0 %v4083_v34 }
0x1184   :  { %3920 = vmatprep.subr.mxu0 %v4377_v10 }
0x120c   :  { %v1905_v46 = vpop.xlane.xlu1 %1904 }
0x120d   :  { %v1906_v47 = vsub.f32 %v1902_v37, %v1905_v46  ;;  %v4920_v37 = vld [vmem:[%s5094_s12 + $0x1] ss:$0 sm:$0xff] }
0x120f   :  { %v1907_v48 = vmul.f32 1.442695, %v1906_v47 }
0x1210   :  { %v2072_v29 = vpop.xlane.xlu0 %2071 }
0x1211   :  { %4207 = vpow2.f32 %v1907_v48  ;;  %v2073_v31 = vsub.f32 %v2069_v44, %v2072_v29 }
0x1213   :  { %v2074_v26 = vmul.f32 1.442695, %v2073_v31 }
0x1215   :  { %4209 = vpow2.f32 %v2074_v26 }
0x121b   :  { %v4208_v40 = vpop.eup %4207 }
0x121c   :  { %v1909_v49 = vsel %vm533_vm15, %v4208_v40, 0.0 }
0x121d   :  { %1910 = vadd.xlane.f32.xlu0 %v1909_v49 }
0x121f   :  { %v4210_v50 = vpop.eup %4209 }
0x1220   :  { %v2076_v51 = vsel %vm533_vm15, %v4210_v50, 0.0 }
0x1221   :  { %2077 = vadd.xlane.f32.xlu1 %v2076_v51 }
0x1232   :  { %2081 = vrot.lane.b32.xlu1 %v1809_v13, %s4383_s11 }
0x1233   :  { %1914 = vrot.lane.b32.xlu0 %v1809_v13, %s4384_s3 }
0x1236   :  { %2311 = vrot.lane.b32.xlu1 %v4852_v20, %s4380_s10 }
0x1237   :  { %2478 = vrot.lane.b32.xlu0 %v4852_v20, %s4379_s30 }
0x123a   :  { %2476 = vrot.lane.b32.xlu1 %v4852_v20, %s4381_s28 }
0x12aa   :  { %v1911_v53 = vpop.xlane.xlu0 %1910 }
0x12ab   :  { %4211 = vrcp.f32 %v1911_v53 }
0x12ae   :  { %v1915_v54 = vpop.permute.xlu0 %1914  ;;  %v2078_v55 = vpop.xlane.xlu1 %2077 }
0x12af   :  { %4213 = vrcp.f32 %v2078_v55  ;;  %3892 = vmatpush3.msra.mxu1 %v1915_v54 }
0x12b0   :  { %3901 = vmatprep.subr.mxu1 %v4377_v10 }
0x12b2   :  { %v2082_v58 = vpop.permute.xlu1 %2081  ;;  %v2479_v4 = vpop.permute.xlu0 %2478 }
0x12b5   :  { %v4212_v25 = vpop.eup %4211 }
0x12b6   :  { %v1913_v56 = vmul.f32 %v4212_v25, %v4208_v40  ;;  %v2312_v2 = vpop.permute.xlu1 %2311 }
0x12b8   :  { %3894 = vmatmul.mubr.msk.f32.vlgmr.msra.gmra.mrb[20].mxu1 %vm533_vm15, %v1913_v56 }
0x12b9   :  { %v4214_v59 = vpop.eup %4213  ;;  %3902 = vmatpush3.msra.mxu1 %v2082_v58  ;;  %3903 = vmatprep.mubr.msk.f32.mxu1 %vm4378_vm12, %v4377_v10 }
0x12ba   :  { %v2080_v61 = vmul.f32 %v4214_v59, %v4210_v50  ;;  %4085 = vmatprep.subr.bf16.mxu1 %v4385_v63  ;;  %v2477_v5 = vpop.permute.xlu1 %2476 }
0x12bc   :  { %3904 = vmatmul.mubr.msk.f32.vlgmr.msra.gmra.mrb[22].mxu1 %vm533_vm15, %v2080_v61  ;;  %v3581_v61 = vld [vmem:[%s5095_s13 + $0x1] ss:$0 sm:$0xff] }
0x12bd   :  { %4087 = vmatpush3.bf16.msra.mxu1 %v4886_v60  ;;  %3917 = vmatprep.mubr.msk.f32.mxu1 %vm4378_vm12, %v4377_v10 }
0x12be   :  { %3925 = vmatprep.subr.mxu1 %v4377_v10 }
0x138b   :  { %v1986_v62 = vpop.f32.mrb[20].mxu1 }
0x138c   :  { %v3895_v0 = vpop.f32.mrb[21].mxu1  ;;  %3918 = vmatmul.mubr.msk.f32.vlgmr.msra.gmra.mrb[24].mxu1 %vm452_vm13, %v1986_v62 }
0x138d   :  { %3927 = vmatprep.mubr.msk.f32.mxu1 %vm4378_vm12, %v4377_v10 }
0x138f   :  { %v2153_v1 = vpop.f32.mrb[22].mxu1 }
0x1390   :  { %v3905_v3 = vpop.f32.mrb[23].mxu1  ;;  %3911 = vmatmul.mubr.msk.f32.vlgmr.msra.gmra.mrb[18].mxu0 %vm452_vm13, %v2153_v1 }
0x1391   :  { %3921 = vmatpush3.xpose.msk.msra.mxu0 %vm452_vm13, %v2312_v2  ;;  %3922 = vmatprep.mubr.msk.f32.mxu0 %vm4378_vm12, %v4377_v10 }
0x1392   :  { %3930 = vmatprep.subr.mxu0 %v4377_v10 }
0x1394   :  { %3923 = vmatmul.mubr.msk.f32.vlgmr.msra.gmra.mrb[20].mxu0 %vm452_vm13, %v4852_v20 }
0x1395   :  { %3931 = vmatpush3.xpose.msk.msra.mxu0 %vm452_vm13, %v2479_v4  ;;  %3932 = vmatprep.mubr.msk.f32.mxu0 %vm4378_vm12, %v4377_v10 }
0x1396   :  { %4088 = vmatprep.subr.bf16.mxu0 %v4385_v63 }
0x1398   :  { %3933 = vmatmul.mubr.msk.f32.vlgmr.msra.gmra.mrb[22].mxu0 %vm452_vm13, %v2477_v5 }
0x1399   :  { %4090 = vmatpush3.bf16.msra.mxu0 %v4083_v34  ;;  %3944 = vmatprep.mubr.msk.f32.mxu0 %vm4378_vm12, %v4377_v10 }
0x145f   :  { %v2299_v6 = vpop.f32.mrb[24].mxu1 }
0x1460   :  { %v3919_v30 = vpop.f32.mrb[25].mxu1 }
0x1463   :  { %v2226_v7 = vpop.f32.mrb[18].mxu0 }
0x1464   :  { %v2300_v9 = vadd.f32 %v2299_v6, %v2226_v7  ;;  %v3912_v12 = vpop.f32.mrb[19].mxu0 }
0x1466   :  { %v2309_v38 = vadd.f32 %v4920_v37, %v2300_v9 }
0x1467   :  { %v2383_v17 = vpop.f32.mrb[20].mxu0 }
0x1468   :  { %v2387_v19 = vmul.f32 0.25, %v2383_v17  ;;  %v3924_v21 = vpop.f32.mrb[21].mxu0  ;;  %v2790_v39 = vadd.f32 %v2309_v38, %v4839_v14 }
0x146a   :  { %v2388_v13 = vadd.f32 %v2387_v19, %v4757_v36  ;;  %v2796_v42 = vsel %vm305_vm11, %v2790_v39, 0.0 }
0x146b   :  { %v2550_v22 = vpop.f32.mrb[22].mxu0 }
0x146c   :  { %v2554_v27 = vmul.f32 0.25, %v2550_v22  ;;  %v3934_v28 = vpop.f32.mrb[23].mxu0  ;;  %v2389_v32 = vsel %vm533_vm15, %v2388_v13, -inf }
0x146d   :  { %2390 = vmax.xlane.f32.xlu0 %v2389_v32  ;;  %v3583_v28 = vld [vmem:[%s5097_s15 + $0x20] sm:$0xff]  ;;  %v3584_v32 = vld [vmem:[%s5097_s15 + $0x28] sm:$0xff] }
0x146e   :  { %v2555_v33 = vadd.f32 %v2554_v27, %v4757_v36 }
0x1470   :  { %v2556_v35 = vsel %vm533_vm15, %v2555_v33, -inf }
0x1471   :  { %2557 = vmax.xlane.f32.xlu1 %v2556_v35  ;;  %v3586_v35 = vld [vmem:[%s5097_s15 + $0x38] sm:$0xff] }
0x1482   :  { %2400 = vrot.lane.b32.xlu1 %v4852_v20, %s4384_s3 }
0x14a6   :  { %2797 = vadd.xlane.f32.xlu1 %v2796_v42 }
0x14fa   :  { %v2391_v43 = vpop.xlane.xlu0 %2390 }
0x14fb   :  { %v2392_v36 = vsub.f32 %v2388_v13, %v2391_v43 }
0x14fd   :  { %v2393_v44 = vmul.f32 1.442695, %v2392_v36 }
0x14fe   :  { %v2558_v45 = vpop.xlane.xlu1 %2557 }
0x14ff   :  { %4215 = vpow2.f32 %v2393_v44  ;;  %v2559_v46 = vsub.f32 %v2555_v33, %v2558_v45  ;;  %v4094_v33 = vpack.c.bf16 %v3584_v32, %v3583_v28 }
0x1501   :  { %v2560_v47 = vmul.f32 1.442695, %v2559_v46  ;;  %4095 = vmatprep.subr.bf16.mxu0 %v4094_v33  ;;  %v2951_v46 = vld [vmem:[#allocation9 + $0x40] sm:$0xff] }
0x1502   :  { %v2401_v48 = vpop.permute.xlu1 %2400 }
0x1503   :  { %4217 = vpow2.f32 %v2560_v47  ;;  %3926 = vmatpush3.msra.mxu1 %v2401_v48  ;;  %v2952_v47 = vld [vmem:[#allocation9 + $0x48] sm:$0xff] }
0x1504   :  { %3935 = vmatprep.subr.mxu1 %v4377_v10  ;;  %v4102_v48 = vpack.c.bf16 %v2952_v47, %v2951_v46  ;;  %v3099_v46 = vld [vmem:[%s5103_s21 + $0x18] sm:$0xff] }
0x1509   :  { %v4216_v29 = vpop.eup %4215 }
0x150a   :  { %v2395_v31 = vsel %vm533_vm15, %v4216_v29, 0.0 }
0x150b   :  { %2396 = vadd.xlane.f32.xlu0 %v2395_v31  ;;  %v2954_v31 = vld [vmem:[#allocation9 + $0x58] sm:$0xff] }
0x150d   :  { %v4218_v14 = vpop.eup %4217 }
0x150e   :  { %v2562_v26 = vsel %vm533_vm15, %v4218_v14, 0.0 }
0x150f   :  { %2563 = vadd.xlane.f32.xlu0 %v2562_v26  ;;  %v2955_v26 = vld [vmem:[#allocation9 + $0x60] sm:$0xff] }
0x1525   :  { %2567 = vrot.lane.b32.xlu0 %v4852_v20, %s4383_s11 }
0x1533   :  { %v2798_v40 = vpop.xlane.xlu1 %2797 }
0x1534   :  { %v2802_v49 = vmul.f32 0.03125, %v2798_v40  ;;  %v2956_v40 = vld [vmem:[#allocation9 + $0x68] sm:$0xff] }
0x1536   :  { %v2804_v50 = vsub.f32 %v2790_v39, %v2802_v49  ;;  %v4110_v49 = vpack.c.bf16 %v2956_v40, %v2955_v26 }
0x1538   :  { %v2806_v51 = vmul.f32 %v2804_v50, %v2804_v50 }
0x153a   :  { %v2808_v41 = vsel %vm305_vm11, %v2806_v51, 0.0  ;;  %v2958_v51 = vld [vmem:[#allocation9 + $0x78] sm:$0xff] }
0x153b   :  { %2809 = vadd.xlane.f32.xlu1 %v2808_v41 }
0x1598   :  { %v2397_v52 = vpop.xlane.xlu0 %2396 }
0x1599   :  { %4219 = vrcp.f32 %v2397_v52  ;;  %v3588_v52 = vld [vmem:[%s5098_s16 + $0x1] ss:$0 sm:$0xff] }
0x159c   :  { %v2564_v34 = vpop.xlane.xlu0 %2563 }
0x159d   :  { %4221 = vrcp.f32 %v2564_v34 }
0x15a0   :  { %v2568_v55 = vpop.permute.xlu0 %2567 }
0x15a3   :  { %v4220_v53 = vpop.eup %4219 }
0x15a4   :  { %v2399_v54 = vmul.f32 %v4220_v53, %v4216_v29  ;;  %v2953_v29 = vld [vmem:[#allocation9 + $0x50] sm:$0xff] }
0x15a6   :  { %3928 = vmatmul.mubr.msk.f32.vlgmr.msra.gmra.mrb[26].mxu1 %vm533_vm15, %v2399_v54 }
0x15a7   :  { %v4222_v25 = vpop.eup %4221  ;;  %3936 = vmatpush3.msra.mxu1 %v2568_v55  ;;  %3937 = vmatprep.mubr.msk.f32.mxu1 %vm4378_vm12, %v4377_v10 }
0x15a8   :  { %v2566_v20 = vmul.f32 %v4222_v25, %v4218_v14  ;;  %4091 = vmatprep.subr.bf16.mxu1 %v4385_v63  ;;  %v4106_v14 = vpack.c.bf16 %v2954_v31, %v2953_v29 }
0x15aa   :  { %3938 = vmatmul.mubr.msk.f32.vlgmr.msra.gmra.mrb[28].mxu1 %vm533_vm15, %v2566_v20 }
0x15ab   :  { %4093 = vmatpush3.bf16.msra.mxu1 %v4886_v60  ;;  %3951 = vmatprep.mubr.msk.f32.mxu1 %vm4378_vm12, %v4377_v10  ;;  %v3582_v60 = vld [vmem:[%s5096_s14 + $0x1] ss:$0 sm:$0xff] }
0x15ac   :  { %4103 = vmatprep.subr.bf16.mxu1 %v4102_v48 }
0x15c8   :  { %v2810_v56 = vpop.xlane.xlu1 %2809 }
0x15c9   :  { %v2814_v57 = vmul.f32 0.03125, %v2810_v56 }
0x15cb   :  { %v2816_v24 = vadd.f32 1e-06, %v2814_v57 }
0x15cd   :  { %4223 = vrsqrt.f32 %v2816_v24 }
0x15d7   :  { %v4224_v58 = vpop.eup %4223 }
0x15d8   :  { %v2820_v59 = vmul.f32 %v4224_v58, %v2804_v50  ;;  %v2957_v50 = vld [vmem:[#allocation9 + $0x70] sm:$0xff] }
0x15d9   :  { %v4114_v41 = vpack.c.bf16 %v2958_v51, %v2957_v50  ;;  %v3597_v50 = vld [vmem:[%s5101_s19 + $0x1] ss:$0 sm:$0xff] }
0x15da   :  { %v2828_v0 = vmul.f32 %v3581_v61, %v2820_v59 }
0x15dc   :  { %v4946_v2 = vadd.f32 %v3582_v60, %v2828_v0 }
0x1679   :  { %v2472_v62 = vpop.f32.mrb[26].mxu1 }
0x167a   :  { %v3929_v63 = vpop.f32.mrb[27].mxu1  ;;  %3952 = vmatmul.mubr.msk.f32.vlgmr.msra.gmra.mrb[30].mxu1 %vm452_vm13, %v2472_v62 }
0x167b   :  { %4105 = vmatpush3.bf16.msra.mxu1 %v4102_v48 }
0x167c   :  { %4107 = vmatprep.subr.bf16.mxu1 %v4106_v14 }
0x167d   :  { %v2639_v1 = vpop.f32.mrb[28].mxu1 }
0x167e   :  { %v3939_v3 = vpop.f32.mrb[29].mxu1  ;;  %3945 = vmatmul.mubr.msk.f32.vlgmr.msra.gmra.mrb[24].mxu0 %vm452_vm13, %v2639_v1  ;;  %vm3506_vm13 = vcmp.eq.s32.totalorder %v4639_v23, 1 }
0x167f   :  { %3962 = vmatprep.mubr.msk.f32.mxu0 %vm305_vm11, %v4946_v2  ;;  %4097 = vmatpush3.bf16.msra.mxu0 %v4094_v33 }
0x1680   :  { %4109 = vmatpush3.bf16.msra.mxu1 %v4106_v14 }
0x1681   :  { %4111 = vmatprep.subr.bf16.mxu1 %v4110_v49 }
0x1684   :  { %4113 = vmatpush3.bf16.msra.mxu1 %v4110_v49 }
0x1685   :  { %4115 = vmatprep.subr.bf16.mxu1 %v4114_v41 }
0x1688   :  { %4117 = vmatpush3.bf16.msra.mxu1 %v4114_v41 }
0x174d   :  { %v2785_v4 = vpop.f32.mrb[30].mxu1 }
0x174e   :  { %v3953_v5 = vpop.f32.mrb[31].mxu1 }
0x1751   :  { %v2712_v6 = vpop.f32.mrb[24].mxu0 }
0x1752   :  { %v2786_v30 = vadd.f32 %v2785_v4, %v2712_v6  ;;  %v3946_v7 = vpop.f32.mrb[25].mxu0 }
0x1753   :  { %v3592_v7 = vld [vmem:[%s5100_s18 + $0x1] ss:$0 sm:$0xff]  ;;  %s5141_s18 = sld [smem:[#allocation25_spill]] }
0x1754   :  { %v2789_v9 = vadd.f32 %v4920_v37, %v2786_v30 }
0x1756   :  { %v2791_v12 = vadd.f32 %v2789_v9, %v4841_v16  ;;  %v3585_v16 = vld [vmem:[%s5097_s15 + $0x30] sm:$0xff] }
0x1757   :  { %v4098_v37 = vpack.c.bf16 %v3586_v35, %v3585_v16 }
0x1758   :  { %v2799_v17 = vsel %vm305_vm11, %v2791_v12, 0.0 }
0x1759   :  { %2800 = vadd.xlane.f32.xlu0 %v2799_v17  ;;  %4099 = vmatprep.subr.bf16.mxu0 %v4098_v37 }
0x175a   :  { %4101 = vmatpush3.bf16.msra.mxu0 %v4098_v37 }
0x17e6   :  { %v2801_v19 = vpop.xlane.xlu0 %2800 }
0x17e7   :  { %v2803_v21 = vmul.f32 0.03125, %v2801_v19 }
0x17e9   :  { %v2805_v13 = vsub.f32 %v2791_v12, %v2803_v21 }
0x17eb   :  { %v2807_v22 = vmul.f32 %v2805_v13, %v2805_v13 }
0x17ed   :  { %v2811_v27 = vsel %vm305_vm11, %v2807_v22, 0.0 }
0x17ee   :  { %2812 = vadd.xlane.f32.xlu0 %v2811_v27 }
0x187b   :  { %v2813_v38 = vpop.xlane.xlu0 %2812 }
0x187c   :  { %v2815_v39 = vmul.f32 0.03125, %v2813_v38 }
0x187e   :  { %v2817_v42 = vadd.f32 1e-06, %v2815_v39 }
0x1880   :  { %4225 = vrsqrt.f32 %v2817_v42 }
0x188a   :  { %v4226_v43 = vpop.eup %4225 }
0x188b   :  { %v2821_v36 = vmul.f32 %v4226_v43, %v2805_v13 }
0x188d   :  { %v2829_v44 = vmul.f32 %v3581_v61, %v2821_v36  ;;  %v3097_v36 = vld [vmem:[%s5103_s21 + $0x8] sm:$0xff] }
0x188f   :  { %v2837_v45 = vadd.f32 %v3582_v60, %v2829_v44 }
0x1891   :  { %3963 = vmatmul.mubr.msk.f32.vlgmr.msra.gmra.mrb[26].mxu0 %vm305_vm11, %v2837_v45 }
0x1964   :  { %v3964_v34 = vpop.f32.mrb[26].mxu0 }
0x1965   :  { %v2929_v53 = vadd.f32 %v3964_v34, %v3588_v52  ;;  %v2923_v54 = vpop.f32.mrb[27].mxu0  ;;  %v3598_v34 = vld [vmem:[%s5102_s20 + $0x1] ss:$0 sm:$0xff] }
0x1966   :  { %v2924_v55 = vadd.f32 %v3588_v52, %v2923_v54 }
0x1967   :  { %v2933_v25 = vmul.f32 %v2929_v53, %v2929_v53 }
0x1968   :  { %v2932_v20 = vmul.f32 %v2924_v55, %v2924_v55 }
0x1969   :  { %v2935_v56 = vmul.f32 %v2933_v25, %v2929_v53 }
0x196a   :  { %v2934_v57 = vmul.f32 %v2932_v20, %v2924_v55  ;;  %v3599_v20 = vld [vmem:[%s5104_s22] ss:$0 sm:$0xff] }
0x196b   :  { %v2937_v24 = vmul.f32 0.044715, %v2935_v56 }
0x196c   :  { %v2936_v58 = vmul.f32 0.044715, %v2934_v57 }
0x196d   :  { %v2939_v59 = vadd.f32 %v2937_v24, %v2929_v53 }
0x196e   :  { %v2938_v61 = vadd.f32 %v2936_v58, %v2924_v55 }
0x196f   :  { %v2941_v62 = vmul.f32 0.7978846, %v2939_v59 }
0x1970   :  { %v2940_v0 = vmul.f32 0.7978846, %v2938_v61 }
0x1971   :  { %4227 = vtanh.f32 %v2941_v62 }
0x1972   :  { %4229 = vtanh.f32 %v2940_v0 }
0x197b   :  { %v4228_v63 = vpop.eup %4227 }
0x197c   :  { %v4230_v60 = vpop.eup %4229  ;;  %v2945_v1 = vadd.f32 1.0, %v4228_v63 }
0x197d   :  { %v2944_v3 = vadd.f32 1.0, %v4230_v60 }
0x197e   :  { %v2947_v4 = vmul.f32 0.5, %v2945_v1 }
0x197f   :  { %v2946_v5 = vmul.f32 0.5, %v2944_v3 }
0x1980   :  { %v2949_v30 = vmul.f32 %v2947_v4, %v2929_v53 }
0x1981   :  { %v2948_v6 = vmul.f32 %v2946_v5, %v2924_v55 }
0x1983   :  { %3981 = vmatprep.mubr.msk.f32.mxu1 %vm219_vm4, %v2948_v6 }
0x1984   :  { %3982 = vmatmul.mubr.msk.f32.vlgmr.msra.gmra.mrb[32].mxu1 %vm219_vm4, %v2949_v30 }
0x1a57   :  { %v3983_v9 = vpop.f32.mrb[32].mxu1 }
0x1a58   :  { %v3045_v12 = vadd.f32 %v3983_v9, %v3592_v7  ;;  %v3039_v17 = vpop.f32.mrb[33].mxu1 }
0x1a59   :  { %v3040_v19 = vadd.f32 %v3592_v7, %v3039_v17 }
0x1a5a   :  { %v3049_v21 = vadd.f32 %v3045_v12, %v2837_v45  ;;  %v3098_v45 = vld [vmem:[%s5103_s21 + $0x10] sm:$0xff] }
0x1a5b   :  { %v3048_v13 = vadd.f32 %v3040_v19, %v4946_v2  ;;  %v3096_v2 = vld [vmem:[%s5103_s21] sm:$0xff]  ;;  %v4122_v47 = vpack.c.bf16 %v3099_v46, %v3098_v45 }
0x1a5c   :  { %v3057_v22 = vsel %vm305_vm11, %v3049_v21, 0.0  ;;  %v4118_v44 = vpack.c.bf16 %v3097_v36, %v3096_v2 }
0x1a5d   :  { %3058 = vadd.xlane.f32.xlu0 %v3057_v22  ;;  %v3054_v27 = vsel %vm305_vm11, %v3048_v13, 0.0 }
0x1a5e   :  { %3055 = vadd.xlane.f32.xlu1 %v3054_v27  ;;  %4119 = vmatprep.subr.bf16.mxu0 %v4118_v44 }
0x1a5f   :  { %4121 = vmatpush3.bf16.msra.mxu0 %v4118_v44  ;;  %v3602_v44 = vld [vmem:[%s5105_s23] ss:$0 sm:$0xff] }
0x1a60   :  { %4123 = vmatprep.subr.bf16.mxu0 %v4122_v47 }
0x1a63   :  { %4125 = vmatpush3.bf16.msra.mxu0 %v4122_v47 }
0x1a64   :  { %4128 = vmatprep.subr.msk.bf16.mxu0 %vm4127_vm0, %v4619_v8 }
0x1aea   :  { %v3059_v28 = vpop.xlane.xlu0 %3058 }
0x1aeb   :  { %v3061_v32 = vmul.f32 0.03125, %v3059_v28  ;;  %v3056_v33 = vpop.xlane.xlu1 %3055 }
0x1aec   :  { %v3060_v16 = vmul.f32 0.03125, %v3056_v33 }
0x1aed   :  { %v3063_v35 = vsub.f32 %v3049_v21, %v3061_v32 }
0x1aee   :  { %v3062_v37 = vsub.f32 %v3048_v13, %v3060_v16 }
0x1aef   :  { %v3065_v38 = vmul.f32 %v3063_v35, %v3063_v35 }
0x1af0   :  { %v3064_v39 = vmul.f32 %v3062_v37, %v3062_v37 }
0x1af1   :  { %v3069_v42 = vsel %vm305_vm11, %v3065_v38, 0.0 }
0x1af2   :  { %3070 = vadd.xlane.f32.xlu0 %v3069_v42  ;;  %v3066_v43 = vsel %vm305_vm11, %v3064_v39, 0.0 }
0x1af3   :  { %3067 = vadd.xlane.f32.xlu1 %v3066_v43 }
0x1b7f   :  { %v3071_v48 = vpop.xlane.xlu0 %3070 }
0x1b80   :  { %v3073_v29 = vmul.f32 0.03125, %v3071_v48  ;;  %v3068_v31 = vpop.xlane.xlu1 %3067  ;;  %v3603_v48 = vld [vmem:[%s5106_s24] ss:$0 sm:$0xff] }
0x1b81   :  { %v3072_v14 = vmul.f32 0.03125, %v3068_v31 }
0x1b82   :  { %v3075_v26 = vadd.f32 1e-06, %v3073_v29 }
0x1b83   :  { %v3074_v40 = vadd.f32 1e-06, %v3072_v14 }
0x1b84   :  { %4231 = vrsqrt.f32 %v3075_v26 }
0x1b85   :  { %4233 = vrsqrt.f32 %v3074_v40  ;;  %v3604_v40 = vld [vmem:[%s5139_s6] ss:$0 sm:$0xff] }
0x1b8e   :  { %v4232_v49 = vpop.eup %4231 }
0x1b8f   :  { %v4234_v51 = vpop.eup %4233  ;;  %v3079_v41 = vmul.f32 %v4232_v49, %v3063_v35 }
0x1b90   :  { %v3078_v52 = vmul.f32 %v4234_v51, %v3062_v37 }
0x1b91   :  { %v3087_v53 = vmul.f32 %v3597_v50, %v3079_v41 }
0x1b92   :  { %v3086_v54 = vmul.f32 %v3597_v50, %v3078_v52 }
0x1b93   :  { %v3095_v25 = vadd.f32 %v3598_v34, %v3087_v53 }
0x1b94   :  { %v3094_v55 = vadd.f32 %v3598_v34, %v3086_v54 }
0x1b96   :  { %3992 = vmatprep.mubr.msk.f32.mxu0 %vm305_vm11, %v3094_v55 }
0x1b97   :  { %3993 = vmatmul.mubr.msk.f32.vlgmr.msra.gmra.mrb[28].mxu0 %vm305_vm11, %v3095_v25 }
0x1b98   :  { %4131 = vmatpush3.bf16.xpose.msk.msra.mxu0 %vm4127_vm0, %v4619_v8 }
0x1b99   :  { %4134 = vmatprep.subr.msk.bf16.mxu0 %vm4127_vm0, %v4622_v11 }
0x1ba0   :  { %4137 = vmatpush3.bf16.xpose.msk.msra.mxu0 %vm4127_vm0, %v4622_v11 }
0x1ba1   :  { %4140 = vmatprep.subr.msk.bf16.mxu0 %vm4127_vm0, %v4627_v15 }
0x1ba8   :  { %4143 = vmatpush3.bf16.xpose.msk.msra.mxu0 %vm4127_vm0, %v4627_v15 }
0x1ba9   :  { %4146 = vmatprep.subr.msk.bf16.mxu0 %vm4127_vm0, %v4631_v18 }
0x1bb0   :  { %4149 = vmatpush3.bf16.xpose.msk.msra.mxu0 %vm4127_vm0, %v4631_v18 }
0x1c6a   :  { %v3994_v56 = vpop.f32.mrb[28].mxu0 }
0x1c6b   :  { %v3185_v57 = vadd.f32 %v3994_v56, %v3599_v20  ;;  %v3179_v24 = vpop.f32.mrb[29].mxu0 }
0x1c6c   :  { %v3180_v58 = vadd.f32 %v3599_v20, %v3179_v24 }
0x1c6d   :  { %v3189_v59 = vmul.f32 %v3185_v57, %v3185_v57 }
0x1c6e   :  { %v3188_v61 = vmul.f32 %v3180_v58, %v3180_v58 }
0x1c6f   :  { %v3191_v62 = vmul.f32 %v3189_v59, %v3185_v57 }
0x1c70   :  { %v3190_v0 = vmul.f32 %v3188_v61, %v3180_v58 }
0x1c71   :  { %v3193_v63 = vmul.f32 0.044715, %v3191_v62 }
0x1c72   :  { %v3192_v60 = vmul.f32 0.044715, %v3190_v0 }
0x1c73   :  { %v3195_v1 = vadd.f32 %v3193_v63, %v3185_v57 }
0x1c74   :  { %v3194_v3 = vadd.f32 %v3192_v60, %v3180_v58 }
0x1c75   :  { %v3197_v4 = vmul.f32 0.7978846, %v3195_v1 }
0x1c76   :  { %v3196_v5 = vmul.f32 0.7978846, %v3194_v3 }
0x1c77   :  { %4235 = vtanh.f32 %v3197_v4 }
0x1c78   :  { %4237 = vtanh.f32 %v3196_v5  ;;  %v5050_v5 = vld [vmem:[%s5140_s1] sm:$0xff] }
0x1c79   :  { %vm3376_vm6 = vcmp.gt.s32.totalorder %v5050_v5, 0 }
0x1c81   :  { %v4236_v6 = vpop.eup %4235 }
0x1c82   :  { %v4238_v30 = vpop.eup %4237  ;;  %v3201_v7 = vadd.f32 1.0, %v4236_v6  ;;  %v3363_v6 = vld [vmem:[%s5140_s1 + $0x8] sm:$0xff] }
0x1c83   :  { %v3200_v9 = vadd.f32 1.0, %v4238_v30  ;;  %vm3377_vm7 = vcmp.gt.s32.totalorder %v3363_v6, 0 }
0x1c84   :  { %v3203_v12 = vmul.f32 0.5, %v3201_v7 }
0x1c85   :  { %v3202_v17 = vmul.f32 0.5, %v3200_v9 }
0x1c86   :  { %v3205_v19 = vmul.f32 %v3203_v12, %v3185_v57 }
0x1c87   :  { %v3204_v21 = vmul.f32 %v3202_v17, %v3180_v58 }
0x1c88   :  { %v3211_v13 = vsel %vm305_vm11, %v3205_v19, 0.0 }
0x1c89   :  { %3212 = vadd.xlane.f32.xlu0 %v3211_v13  ;;  %v3208_v22 = vsel %vm305_vm11, %v3204_v21, 0.0 }
0x1c8a   :  { %3209 = vadd.xlane.f32.xlu1 %v3208_v22 }
0x1d16   :  { %v3213_v27 = vpop.xlane.xlu0 %3212 }
0x1d17   :  { %v3215_v28 = vmul.f32 0.03125, %v3213_v27  ;;  %v3210_v32 = vpop.xlane.xlu1 %3209 }
0x1d18   :  { %v3214_v33 = vmul.f32 0.03125, %v3210_v32 }
0x1d19   :  { %v3217_v16 = vsub.f32 %v3205_v19, %v3215_v28 }
0x1d1a   :  { %v3216_v35 = vsub.f32 %v3204_v21, %v3214_v33 }
0x1d1b   :  { %v3219_v37 = vmul.f32 %v3217_v16, %v3217_v16 }
0x1d1c   :  { %v3218_v8 = vmul.f32 %v3216_v35, %v3216_v35 }
0x1d1d   :  { %v3223_v38 = vsel %vm305_vm11, %v3219_v37, 0.0 }
0x1d1e   :  { %3224 = vadd.xlane.f32.xlu0 %v3223_v38  ;;  %v3220_v11 = vsel %vm305_vm11, %v3218_v8, 0.0 }
0x1d1f   :  { %3221 = vadd.xlane.f32.xlu1 %v3220_v11 }
0x1dab   :  { %v3225_v39 = vpop.xlane.xlu0 %3224 }
0x1dac   :  { %v3227_v15 = vmul.f32 0.03125, %v3225_v39  ;;  %v3222_v42 = vpop.xlane.xlu1 %3221  ;;  %v3617_v39 = vsel %vm3376_vm6, 1.0, %v4377_v10 }
0x1dad   :  { %v3226_v43 = vmul.f32 0.03125, %v3222_v42 }
0x1dae   :  { %v3229_v2 = vadd.f32 1e-06, %v3227_v15  ;;  %v3618_v15 = vsel %vm3377_vm7, 1.0, %v4377_v10 }
0x1daf   :  { %v3228_v18 = vadd.f32 1e-06, %v3226_v43 }
0x1db0   :  { %4239 = vrsqrt.f32 %v3229_v2 }
0x1db1   :  { %4241 = vrsqrt.f32 %v3228_v18 }
0x1dba   :  { %v4240_v36 = vpop.eup %4239 }
0x1dbb   :  { %v4242_v45 = vpop.eup %4241  ;;  %v3233_v46 = vmul.f32 %v4240_v36, %v3217_v16 }
0x1dbc   :  { %v3232_v47 = vmul.f32 %v4242_v45, %v3216_v35  ;;  %v3420_v45 = vsel %vm3418_vm10, %v3618_v15, 0.0 }
0x1dbd   :  { %v3241_v29 = vmul.f32 %v3602_v44, %v3233_v46 }
0x1dbe   :  { %v3240_v31 = vmul.f32 %v3602_v44, %v3232_v47  ;;  %v3419_v44 = vsel %vm3418_vm10, %v3617_v39, 0.0 }
0x1dbf   :  { %v3249_v26 = vadd.f32 %v3603_v48, %v3241_v29 }
0x1dc0   :  { %v3248_v14 = vadd.f32 %v3603_v48, %v3240_v31  ;;  %v3421_v48 = vadd.f32 %v3420_v45, %v3419_v44 }
0x1dc2   :  { %4011 = vmatprep.mubr.msk.f32.mxu0 %vm305_vm11, %v3248_v14 }
0x1dc3   :  { %4012 = vmatmul.mubr.msk.f32.vlgmr.msra.gmra.mrb[30].mxu0 %vm305_vm11, %v3249_v26 }
0x1e96   :  { %v4013_v49 = vpop.f32.mrb[30].mxu0 }
0x1e97   :  { %v5029_v50 = vadd.f32 %v4013_v49, %v3604_v40  ;;  %v3353_v51 = vpop.f32.mrb[31].mxu0 }
0x1e98   :  { %v5031_v41 = vadd.f32 %v3604_v40, %v3353_v51 }
0x1e99   :  { %v3385_v52 = vsel %vm219_vm4, %v5029_v50, -inf }
0x1e9a   :  { %3386 = vmax.xlane.f32.xlu0 %v3385_v52  ;;  %v3382_v34 = vsel %vm219_vm4, %v5031_v41, -inf }
0x1e9b   :  { %3383 = vmax.xlane.f32.xlu1 %v3382_v34 }
0x1f27   :  { %v3387_v53 = vpop.xlane.xlu0 %3386 }
0x1f28   :  { %v3389_v54 = vsub.f32 %v5029_v50, %v3387_v53  ;;  %vm3451_vm1 = vcmp.ge.f32.partialorder %v5029_v50, %v3387_v53  ;;  %v3384_v55 = vpop.xlane.xlu1 %3383 }
0x1f29   :  { %v3388_v25 = vsub.f32 %v5031_v41, %v3384_v55  ;;  %vm3450_vm2 = vcmp.ge.f32.partialorder %v5031_v41, %v3384_v55  ;;  %v3453_v20 = vsel %vm3451_vm1, %v4639_v23, 64 }
0x1f2a   :  { %v3392_v56 = vmul.f32 1.442695, %v3389_v54  ;;  %v3469_v57 = vsel %vm219_vm4, %v3453_v20, 2147483647  ;;  %v3452_v24 = vsel %vm3450_vm2, %v4639_v23, 64 }
0x1f2b   :  { %v3390_v58 = vmul.f32 1.442695, %v3388_v25  ;;  %v3471_v59 = vshra.s32 %v3469_v57, 16  ;;  %v3454_v61 = vsel %vm219_vm4, %v3452_v24, 2147483647  ;;  %v3470_v30 = vand.u32 65535, %v3469_v57 }
0x1f2c   :  { %4243 = vpow2.f32 %v3392_v56  ;;  %v3456_v62 = vshra.s32 %v3454_v61, 16  ;;  %v3455_v7 = vand.u32 65535, %v3454_v61 }
0x1f2d   :  { %4245 = vpow2.f32 %v3390_v58  ;;  %v3473_v0 = vcvt.s32.f32 %v3471_v59  ;;  %v3472_v12 = vcvt.s32.f32 %v3470_v30 }
0x1f2e   :  { %v3458_v63 = vcvt.s32.f32 %v3456_v62  ;;  %v3457_v19 = vcvt.s32.f32 %v3455_v7 }
0x1f2f   :  { %3474 = vmin.xlane.f32.xlu0 %v3473_v0 }
0x1f30   :  { %3459 = vmin.xlane.f32.xlu1 %v3458_v63 }
0x1f36   :  { %v4244_v60 = vpop.eup %4243 }
0x1f37   :  { %v4246_v1 = vpop.eup %4245  ;;  %v3397_v3 = vsel %vm219_vm4, %v4244_v60, 0.0 }
0x1f38   :  { %3398 = vadd.xlane.f32.xlu0 %v3397_v3  ;;  %v3394_v4 = vsel %vm219_vm4, %v4246_v1, 0.0 }
0x1f39   :  { %3395 = vadd.xlane.f32.xlu1 %v3394_v4 }
0x1f4a   :  { %3365 = vperm.xlu1 %4174, %v5050_v5  }
0x1f4e   :  { %3368 = vperm.xlu0 %4173, %v3363_v6  }
0x1fbc   :  { %v3475_v9 = vpop.xlane.xlu0 %3474 }
0x1fbd   :  { %v3460_v17 = vpop.xlane.xlu1 %3459  ;;  %vm3476_vm3 = vcmp.eq.f32.partialorder %v3473_v0, %v3475_v9  ;;  %v3481_v29 = vcvt.f32.s32 %v3475_v9 }
0x1fbe   :  { %v3477_v21 = vsel %vm3476_vm3, %v3472_v12, inf  ;;  %vm3461_vm5 = vcmp.eq.f32.partialorder %v3458_v63, %v3460_v17  ;;  %v3466_v31 = vcvt.f32.s32 %v3460_v17 }
0x1fbf   :  { %3478 = vmin.xlane.f32.xlu0 %v3477_v21  ;;  %v3462_v13 = vsel %vm3461_vm5, %v3457_v19, inf  ;;  %v3482_v26 = vshll.u32 %v3481_v29, 16 }
0x1fc0   :  { %3463 = vmin.xlane.f32.xlu1 %v3462_v13 }
0x1fc5   :  { %v3399_v22 = vpop.xlane.xlu0 %3398 }
0x1fc6   :  { %4247 = vlog2.f32 %v3399_v22  ;;  %v3396_v27 = vpop.xlane.xlu1 %3395 }
0x1fc7   :  { %4249 = vlog2.f32 %v3396_v27 }
0x1fca   :  { %v3366_v35 = vpop.permute.xlu1 %3365 }
0x1fcb   :  { %vm3370_vm9 = vcmp.eq.s32.totalorder %v4639_v23, %v3366_v35 }
0x1fcc   :  { %v3615_v2 = vsel %vm3370_vm9, 1.0, %v4377_v10 }
0x1fcd   :  { %v3369_v32 = vpop.permute.xlu0 %3368 }
0x1fce   :  { %vm3371_vm8 = vcmp.eq.s32.totalorder %v4639_v23, %v3369_v32 }
0x1fcf   :  { %v3616_v42 = vsel %vm3371_vm8, 1.0, %v4377_v10 }
0x1fd0   :  { %v4248_v28 = vpop.eup %4247 }
0x1fd1   :  { %v4250_v33 = vpop.eup %4249  ;;  %v3403_v16 = vmul.f32 0.6931472, %v4248_v28 }
0x1fd2   :  { %v3401_v37 = vmul.f32 0.6931472, %v4250_v33 }
0x1fd3   :  { %v3405_v8 = vadd.f32 %v3403_v16, %v3387_v53 }
0x1fd4   :  { %v3404_v38 = vadd.f32 %v3401_v37, %v3384_v55 }
0x1fd5   :  { %v3407_v11 = vsub.f32 %v5029_v50, %v3405_v8  ;;  %v3467_v50 = vshll.u32 %v3466_v31, 16 }
0x1fd6   :  { %v3406_v43 = vsub.f32 %v5031_v41, %v3404_v38 }
0x1fd7   :  { %v3409_v18 = vmul.f32 %v3616_v42, %v3407_v11 }
0x1fd8   :  { %v3408_v36 = vmul.f32 %v3615_v2, %v3406_v43 }
0x1fd9   :  { %v3413_v46 = vsel %vm219_vm4, %v3409_v18, 0.0 }
0x1fda   :  { %3414 = vadd.xlane.f32.xlu0 %v3413_v46  ;;  %v3410_v47 = vsel %vm219_vm4, %v3408_v36, 0.0  ;;  %vm3504_vm4 = vcmp.eq.s32.totalorder %v4639_v23, 0 }
0x1fdb   :  { %3411 = vadd.xlane.f32.xlu1 %v3410_v47 }
0x1fdf   :  { %3422 = vadd.xlane.f32.xlu1 %v3421_v48 }
0x204c   :  { %v3479_v14 = vpop.xlane.xlu0 %3478 }
0x204d   :  { %v3480_v40 = vcvt.f32.s32 %v3479_v14  ;;  %v3464_v49 = vpop.xlane.xlu1 %3463 }
0x204e   :  { %v3465_v51 = vcvt.f32.s32 %v3464_v49 }
0x204f   :  { %v3483_v41 = vadd.s32 %v3482_v26, %v3480_v40 }
0x2050   :  { %v3468_v52 = vadd.s32 %v3467_v50, %v3465_v51 }
0x2051   :  { %vm3485_vm11 = vcmp.eq.s32.totalorder %v3483_v41, %v3363_v6 }
0x2052   :  { %vm3484_vm12 = vcmp.eq.s32.totalorder %v3468_v52, %v5050_v5  ;;  %v3620_v34 = vsel %vm3485_vm11, 1.0, %v4377_v10 }
0x2053   :  { %v3619_v53 = vsel %vm3484_vm12, 1.0, %v4377_v10  ;;  %v3491_v54 = vmul.f32 %v3620_v34, %v3618_v15 }
0x2054   :  { %v3490_v55 = vmul.f32 %v3619_v53, %v3617_v39 }
0x2055   :  { %v3493_v25 = vsel %vm3418_vm10, %v3491_v54, 0.0 }
0x2056   :  { %v3492_v20 = vsel %vm3418_vm10, %v3490_v55, 0.0 }
0x2057   :  { %v3494_v56 = vadd.f32 %v3493_v25, %v3492_v20 }
0x2059   :  { %3495 = vadd.xlane.f32.xlu1 %v3494_v56 }
0x2067   :  { %v3415_v57 = vpop.xlane.xlu0 %3414 }
0x2068   :  { %v3417_v24 = vsub.f32 0.0, %v3415_v57  ;;  %v3412_v58 = vpop.xlane.xlu1 %3411 }
0x2069   :  { %v3416_v59 = vsub.f32 0.0, %v3412_v58 }
0x206a   :  { %v3434_v61 = vmul.f32 %v3618_v15, %v3417_v24 }
0x206b   :  { %v3433_v62 = vmul.f32 %v3617_v39, %v3416_v59 }
0x206c   :  { %v3436_v0 = vsel %vm3418_vm10, %v3434_v61, 0.0  ;;  %v3423_v63 = vpop.xlane.xlu1 %3422 }
0x206d   :  { %v3435_v60 = vsel %vm3418_vm10, %v3433_v62, 0.0  ;;  %v3424_v10 = vrot.slane %v3423_v63, 4 }
0x206e   :  { %v3437_v1 = vadd.f32 %v3436_v0, %v3435_v60 }
0x206f   :  { %v3425_v3 = vadd.f32 %v3424_v10, %v3423_v63 }
0x2070   :  { %3438 = vadd.xlane.f32.xlu0 %v3437_v1 }
0x2071   :  { %v3426_v4 = vrot.slane %v3425_v3, 2 }
0x2073   :  { %v3427_v5 = vadd.f32 %v3426_v4, %v3425_v3 }
0x2075   :  { %v3428_v6 = vrot.slane %v3427_v5, 1 }
0x2077   :  { %v3429_v30 = vadd.f32 %v3428_v6, %v3427_v5 }
0x2079   :  { %4150 = vpush %v3429_v30 }
0x20aa   :  { %s4151_s26 = spop %4150 }
0x20ab   :  { %v3431_v37 = vstv %s4151_s26 }
0x20ac   :  { %v3432_v8 = vadd.f32 1e-06, %v3431_v37 }
0x20ae   :  { %4251 = vrcp.f32 %v3432_v8  ;;  %v3511_v18 = vsel %vm3510_vm14, %v3432_v8, 0.0 }
0x20b8   :  { %v4252_v38 = vpop.eup %4251 }
0x20e6   :  { %v3496_v7 = vpop.xlane.xlu1 %3495 }
0x20e7   :  { %v3497_v9 = vrot.slane %v3496_v7, 4 }
0x20e9   :  { %v3498_v12 = vadd.f32 %v3497_v9, %v3496_v7 }
0x20eb   :  { %v3499_v17 = vrot.slane %v3498_v12, 2 }
0x20ed   :  { %v3500_v22 = vadd.f32 %v3499_v17, %v3498_v12 }
0x20ef   :  { %v3501_v32 = vrot.slane %v3500_v22, 1 }
0x20f1   :  { %v3502_v35 = vadd.f32 %v3501_v32, %v3500_v22 }
0x20fd   :  { %v3439_v19 = vpop.xlane.xlu0 %3438 }
0x20fe   :  { %v3440_v21 = vrot.slane %v3439_v19, 4 }
0x2100   :  { %v3441_v13 = vadd.f32 %v3440_v21, %v3439_v19 }
0x2102   :  { %v3442_v27 = vrot.slane %v3441_v13, 2 }
0x2104   :  { %v3443_v28 = vadd.f32 %v3442_v27, %v3441_v13 }
0x2106   :  { %v3444_v33 = vrot.slane %v3443_v28, 1 }
0x2108   :  { %v3445_v16 = vadd.f32 %v3444_v33, %v3443_v28 }
0x210a   :  { %4152 = vpush %v3445_v16 }
0x210b   :  { %4154 = vpush %v3502_v35 }
0x213b   :  { %s4153_s15 = spop %4152 }
0x213c   :  { %v3447_v11 = vstv %s4153_s15  ;;  %s4155_s8 = spop %4154 }
0x213d   :  { %v3449_v39 = vmul.f32 %v4252_v38, %v3447_v11  ;;  %v3507_v15 = vstv %s4155_s8 }
0x213e   :  { %v3508_v43 = vsel %vm3506_vm13, %v3507_v15, 0.0 }
0x213f   :  { %v3505_v42 = vsel %vm3504_vm4, %v3449_v39, 0.0 }
0x2140   :  { %v3509_v2 = vadd.f32 %v3508_v43, %v3505_v42 }
0x2142   :  { %v3512_v36 = vadd.f32 %v3511_v18, %v3509_v2 }
0x2144   :  { %3513 = vst [vmem:[%s5141_s18] sm:$0x1] %v3512_v36 }
0x2145   :  { %3518 = vsyncpa [#allocation3], 1 }
0x2146   :  { %3519 = vsyncpa [#allocation5], 1 }
0x2147   :  { %3520 = vsyncpa [#allocation8], 1 }

</bundles_post_ra>
